<compile_context>
chip_gen: v7x
topology: tpu7x:2x2x1
jax: 0.10.0
libtpu: 0.0.40
codegen_flags: <defaults>
</compile_context>

<pallas_src>
import math
import jax
import jax.numpy as jnp
from jax import lax
from jax.experimental import pallas as pl
from jax.experimental.pallas import tpu as pltpu


def make_block_kernel(n_head, head_dim, scale, ln_eps):
    """Pallas kernel for one batch element of the GPT-2 Block."""
    inv_sqrt_d = 1.0 / math.sqrt(head_dim)

    def kernel(x_ref, ln1g_ref, ln1b_ref,
               w_attn_ref, b_attn_ref, w_aproj_ref, b_aproj_ref,
               ln2g_ref, ln2b_ref,
               w_fc_ref, b_fc_ref, w_mproj_ref, b_mproj_ref,
               out_h_ref, out_k_ref, out_v_ref,
               attn_acc_ref):
        x = x_ref[0]                      # (T, C) float32
        T, C = x.shape

        def layer_norm(h, g, b):          # f32 elementwise math
            mu = jnp.mean(h, axis=-1, keepdims=True)
            var = jnp.mean((h - mu) ** 2, axis=-1, keepdims=True)
            return (h - mu) * lax.rsqrt(var + ln_eps) * g + b

        # ---- ln_1 ----
        h1 = layer_norm(x, ln1g_ref[0], ln1b_ref[0])

        # ---- attention: c_attn (Conv1D == x @ W + b), bf16 MXU inputs / f32 acc
        qkv = jnp.dot(h1.astype(jnp.bfloat16), w_attn_ref[...],
                      preferred_element_type=jnp.float32) + b_attn_ref[0]
        q = qkv[:, :C]
        k = qkv[:, C:2 * C]
        v = qkv[:, 2 * C:]

        # present K/V as lane-dense (T, C) slabs; head split happens in wrapper.
        out_k_ref[0] = k
        out_v_ref[0] = v

        # Causal mask (nd == ns == T) computed once.
        row = lax.broadcasted_iota(jnp.int32, (T, T), 0)
        col = lax.broadcasted_iota(jnp.int32, (T, T), 1)
        causal = col <= row

        # Per-head attention; each head's output is stored straight into a VMEM
        # scratch slab (no list / concatenate, bounded live ranges).
        for h in range(n_head):
            sl = slice(h * head_dim, (h + 1) * head_dim)
            qh = q[:, sl].astype(jnp.bfloat16)
            kh = k[:, sl].astype(jnp.bfloat16)
            vh = v[:, sl].astype(jnp.bfloat16)
            # QK^T without materializing a transpose (contract dim 1 of both).
            s = lax.dot_general(qh, kh,
                                dimension_numbers=(((1,), (1,)), ((), ())),
                                preferred_element_type=jnp.float32)   # (T, T) f32
            if scale:
                s = s * inv_sqrt_d
            s = jnp.where(causal, s, -10000.0)        # single select, f32 logits
            s = s - jnp.max(s, axis=-1, keepdims=True)
            e = jnp.exp(s)
            p = e * pl.reciprocal(jnp.sum(e, axis=-1, keepdims=True), approx=True)
            attn_acc_ref[:, sl] = jnp.dot(p.astype(jnp.bfloat16), vh,
                                          preferred_element_type=jnp.float32)

        # ---- attention: c_proj ----
        a = jnp.dot(attn_acc_ref[...].astype(jnp.bfloat16), w_aproj_ref[...],
                    preferred_element_type=jnp.float32) + b_aproj_ref[0]

        x1 = x + a

        # ---- ln_2 + MLP ----
        h2 = layer_norm(x1, ln2g_ref[0], ln2b_ref[0])
        f = jnp.dot(h2.astype(jnp.bfloat16), w_fc_ref[...],
                    preferred_element_type=jnp.float32) + b_fc_ref[0]
        # gelu (tanh approximation, exactly as in the reference module), f32 math
        f = 0.5 * f * (1.0 + jnp.tanh(math.sqrt(2.0 / math.pi)
                                      * (f + 0.044715 * f ** 3)))
        m = jnp.dot(f.astype(jnp.bfloat16), w_mproj_ref[...],
                    preferred_element_type=jnp.float32) + b_mproj_ref[0]

        out_h_ref[0] = x1 + m

    return kernel


def gpt2_block(x, params, n_head, scale=False, ln_eps=1e-5):
    B, T, C = x.shape
    head_dim = C // n_head
    (ln1g, ln1b, w_attn, b_attn, w_aproj, b_aproj,
     ln2g, ln2b, w_fc, b_fc, w_mproj, b_mproj) = params

    # Cast weight matrices to bf16 once outside the kernel: halves weight
    # VMEM/HBM footprint and feeds the MXU's native bf16 path. Biases/LN stay f32.
    bf16 = lambda w: w.astype(jnp.bfloat16)
    w_attn, w_aproj, w_fc, w_mproj = map(bf16, (w_attn, w_aproj, w_fc, w_mproj))

    kernel = make_block_kernel(n_head, head_dim, scale, ln_eps)

    def full(shape):
        nd = len(shape)
        return pl.BlockSpec(shape, lambda b, _n=nd: (0,) * _n)

    in_specs = [
        pl.BlockSpec((1, T, C), lambda b: (b, 0, 0)),      # x
        full((1, C)), full((1, C)),                        # ln_1 gamma / beta
        full((C, 3 * C)), full((1, 3 * C)),                # c_attn W / b
        full((C, C)), full((1, C)),                        # attn c_proj W / b
        full((1, C)), full((1, C)),                        # ln_2 gamma / beta
        full((C, 4 * C)), full((1, 4 * C)),                # mlp c_fc W / b
        full((4 * C, C)), full((1, C)),                    # mlp c_proj W / b
    ]
    out_specs = [
        pl.BlockSpec((1, T, C), lambda b: (b, 0, 0)),      # hidden states
        pl.BlockSpec((1, T, C), lambda b: (b, 0, 0)),      # present K slab
        pl.BlockSpec((1, T, C), lambda b: (b, 0, 0)),      # present V slab
    ]
    out_shape = (
        jax.ShapeDtypeStruct((B, T, C), jnp.float32),
        jax.ShapeDtypeStruct((B, T, C), jnp.float32),
        jax.ShapeDtypeStruct((B, T, C), jnp.float32),
    )

    h, k_slab, v_slab = pl.pallas_call(
        kernel,
        grid=(B,),
        in_specs=in_specs,
        out_specs=out_specs,
        out_shape=out_shape,
        scratch_shapes=[pltpu.VMEM((T, C), jnp.float32)],   # attention output slab
        compiler_params=pltpu.CompilerParams(
            dimension_semantics=("parallel",),
            vmem_limit_bytes=64 * 1024 * 1024),
    )(x, ln1g, ln1b, w_attn, b_attn, w_aproj, b_aproj,
      ln2g, ln2b, w_fc, b_fc, w_mproj, b_mproj)

    # present == torch.stack((key.transpose(-2, -1), value)) : (2, B, H, T, Dh)
    split_heads = lambda t: t.reshape(B, T, n_head, head_dim).transpose(0, 2, 1, 3)
    present = jnp.stack([split_heads(k_slab), split_heads(v_slab)], axis=0)
    return h, present


def init_params(key, C):
    """Deterministic parameter init matching Conv1D (std=0.02) / LayerNorm."""
    ks = jax.random.split(key, 4)
    std = 0.02
    ln1g = jnp.ones((1, C), jnp.float32)
    ln1b = jnp.zeros((1, C), jnp.float32)
    w_attn = std * jax.random.normal(ks[0], (C, 3 * C), jnp.float32)
    b_attn = jnp.zeros((1, 3 * C), jnp.float32)
    w_aproj = std * jax.random.normal(ks[1], (C, C), jnp.float32)
    b_aproj = jnp.zeros((1, C), jnp.float32)
    ln2g = jnp.ones((1, C), jnp.float32)
    ln2b = jnp.zeros((1, C), jnp.float32)
    w_fc = std * jax.random.normal(ks[2], (C, 4 * C), jnp.float32)
    b_fc = jnp.zeros((1, 4 * C), jnp.float32)
    w_mproj = std * jax.random.normal(ks[3], (4 * C, C), jnp.float32)
    b_mproj = jnp.zeros((1, C), jnp.float32)
    return [ln1g, ln1b, w_attn, b_attn, w_aproj, b_aproj,
            ln2g, ln2b, w_fc, b_fc, w_mproj, b_mproj]


def ref_block(x, params, n_head, scale=False, eps=1e-5):
    """Pure-JAX f32 reference mirroring the PyTorch Block forward."""
    (ln1g, ln1b, w_attn, b_attn, w_aproj, b_aproj,
     ln2g, ln2b, w_fc, b_fc, w_mproj, b_mproj) = params
    B, T, C = x.shape
    Dh = C // n_head

    def ln(h, g, b):
        mu = h.mean(-1, keepdims=True)
        var = ((h - mu) ** 2).mean(-1, keepdims=True)
        return (h - mu) / jnp.sqrt(var + eps) * g[0] + b[0]

    h1 = ln(x, ln1g, ln1b)
    qkv = h1 @ w_attn + b_attn[0]
    q, k, v = jnp.split(qkv, 3, axis=-1)
    heads = lambda t: t.reshape(B, T, n_head, Dh).transpose(0, 2, 1, 3)
    qh, kh, vh = heads(q), heads(k), heads(v)
    w = jnp.einsum('bhtd,bhsd->bhts', qh, kh)
    if scale:
        w = w / math.sqrt(Dh)
    mask = jnp.tril(jnp.ones((T, T), jnp.float32))
    w = w * mask - 10000.0 * (1.0 - mask)
    p = jax.nn.softmax(w, axis=-1)
    a = jnp.einsum('bhts,bhsd->bhtd', p, vh).transpose(0, 2, 1, 3).reshape(B, T, C)
    a = a @ w_aproj + b_aproj[0]
    x1 = x + a
    h2 = ln(x1, ln2g, ln2b)
    f = h2 @ w_fc + b_fc[0]
    f = 0.5 * f * (1.0 + jnp.tanh(math.sqrt(2.0 / math.pi) * (f + 0.044715 * f ** 3)))
    m = f @ w_mproj + b_mproj[0]
    return x1 + m, jnp.stack([kh, vh], axis=0)


if __name__ == "__main__":
    B, T, C, n_head = 2, 8, 32, 4          # n_ctx == T, n_embd == C
    key = jax.random.PRNGKey(0)
    kx, kp = jax.random.split(key)
    x = jax.random.normal(kx, (B, T, C), jnp.float32)
    params = init_params(kp, C)

    h, present = gpt2_block(x, params, n_head, scale=True)
    h = jax.block_until_ready(h)
    present = jax.block_until_ready(present)

    h_ref, present_ref = ref_block(x, params, n_head, scale=True)
    # Tolerance accounts for bf16 MXU inputs + approx reciprocal (ref is pure f32).
    assert h.shape == (B, T, C)
    assert present.shape == (2, B, n_head, T, C // n_head)
    assert jnp.allclose(h, h_ref, atol=1e-2, rtol=1e-2)
    assert jnp.allclose(present, present_ref, atol=1e-2, rtol=1e-2)

    print("KERNEL_OK")
</pallas_src>

<mosaic_0001>
module attributes {stable_mosaic.version = 11 : i64} {
  func.func @kernel(%arg0: i32, %arg1: memref<1x8x32xf32, #tpu.memory_space<vmem>>, %arg2: memref<1x32xf32, #tpu.memory_space<vmem>>, %arg3: memref<1x32xf32, #tpu.memory_space<vmem>>, %arg4: memref<32x96xbf16, #tpu.memory_space<vmem>>, %arg5: memref<1x96xf32, #tpu.memory_space<vmem>>, %arg6: memref<32x32xbf16, #tpu.memory_space<vmem>>, %arg7: memref<1x32xf32, #tpu.memory_space<vmem>>, %arg8: memref<1x32xf32, #tpu.memory_space<vmem>>, %arg9: memref<1x32xf32, #tpu.memory_space<vmem>>, %arg10: memref<32x128xbf16, #tpu.memory_space<vmem>>, %arg11: memref<1x128xf32, #tpu.memory_space<vmem>>, %arg12: memref<128x32xbf16, #tpu.memory_space<vmem>>, %arg13: memref<1x32xf32, #tpu.memory_space<vmem>>, %arg14: memref<1x8x32xf32, #tpu.memory_space<vmem>>, %arg15: memref<1x8x32xf32, #tpu.memory_space<vmem>>, %arg16: memref<1x8x32xf32, #tpu.memory_space<vmem>>, %arg17: memref<8x32xf32, #tpu.memory_space<vmem>>) attributes {dimension_semantics = [#tpu.dimension_semantics<parallel>], iteration_bounds = array<i64: 2>, scalar_prefetch = 0 : i64, scratch_operands = 1 : i64, tpu.core_type = #tpu.core_type<tc>, window_params = [{transform_indices = @transform_0, window_bounds = array<i64: 1, 8, 32>}, {pipeline_mode = #tpu.pipeline_mode<synchronous>, transform_indices = @transform_1, window_bounds = array<i64: 1, 32>}, {pipeline_mode = #tpu.pipeline_mode<synchronous>, transform_indices = @transform_2, window_bounds = array<i64: 1, 32>}, {pipeline_mode = #tpu.pipeline_mode<synchronous>, transform_indices = @transform_3, window_bounds = array<i64: 32, 96>}, {pipeline_mode = #tpu.pipeline_mode<synchronous>, transform_indices = @transform_4, window_bounds = array<i64: 1, 96>}, {pipeline_mode = #tpu.pipeline_mode<synchronous>, transform_indices = @transform_5, window_bounds = array<i64: 32, 32>}, {pipeline_mode = #tpu.pipeline_mode<synchronous>, transform_indices = @transform_6, window_bounds = array<i64: 1, 32>}, {pipeline_mode = #tpu.pipeline_mode<synchronous>, transform_indices = @transform_7, window_bounds = array<i64: 1, 32>}, {pipeline_mode = #tpu.pipeline_mode<synchronous>, transform_indices = @transform_8, window_bounds = array<i64: 1, 32>}, {pipeline_mode = #tpu.pipeline_mode<synchronous>, transform_indices = @transform_9, window_bounds = array<i64: 32, 128>}, {pipeline_mode = #tpu.pipeline_mode<synchronous>, transform_indices = @transform_10, window_bounds = array<i64: 1, 128>}, {pipeline_mode = #tpu.pipeline_mode<synchronous>, transform_indices = @transform_11, window_bounds = array<i64: 128, 32>}, {pipeline_mode = #tpu.pipeline_mode<synchronous>, transform_indices = @transform_12, window_bounds = array<i64: 1, 32>}, {transform_indices = @transform_13, window_bounds = array<i64: 1, 8, 32>}, {transform_indices = @transform_14, window_bounds = array<i64: 1, 8, 32>}, {transform_indices = @transform_15, window_bounds = array<i64: 1, 8, 32>}]} {
    %c0 = arith.constant 0 : index
    %c0_0 = arith.constant 0 : index
    %c0_1 = arith.constant 0 : index
    %0 = vector.load %arg1[%c0, %c0_0, %c0_1] : memref<1x8x32xf32, #tpu.memory_space<vmem>>, vector<1x8x32xf32>
    %1 = vector.shape_cast %0 : vector<1x8x32xf32> to vector<8x32xf32>
    %c0_2 = arith.constant 0 : index
    %c0_3 = arith.constant 0 : index
    %2 = vector.load %arg2[%c0_2, %c0_3] : memref<1x32xf32, #tpu.memory_space<vmem>>, vector<1x32xf32>
    %3 = vector.shape_cast %2 : vector<1x32xf32> to vector<32xf32>
    %c0_4 = arith.constant 0 : index
    %c0_5 = arith.constant 0 : index
    %4 = vector.load %arg3[%c0_4, %c0_5] : memref<1x32xf32, #tpu.memory_space<vmem>>, vector<1x32xf32>
    %5 = vector.shape_cast %4 : vector<1x32xf32> to vector<32xf32>
    %cst = arith.constant dense<0.000000e+00> : vector<8xf32>
    %6 = vector.multi_reduction <add>, %1, %cst [1] : vector<8x32xf32> to vector<8xf32>
    %7 = vector.shape_cast %6 : vector<8xf32> to vector<8x1xf32>
    %cst_6 = arith.constant 3.200000e+01 : f32
    %8 = vector.broadcast %cst_6 : f32 to vector<8x1xf32>
    %9 = arith.divf %7, %8 : vector<8x1xf32>
    %10 = vector.broadcast %9 : vector<8x1xf32> to vector<8x32xf32>
    %11 = arith.subf %1, %10 : vector<8x32xf32>
    %12 = arith.mulf %11, %11 : vector<8x32xf32>
    %cst_7 = arith.constant dense<0.000000e+00> : vector<8xf32>
    %13 = vector.multi_reduction <add>, %12, %cst_7 [1] : vector<8x32xf32> to vector<8xf32>
    %14 = vector.shape_cast %13 : vector<8xf32> to vector<8x1xf32>
    %cst_8 = arith.constant 3.200000e+01 : f32
    %15 = vector.broadcast %cst_8 : f32 to vector<8x1xf32>
    %16 = arith.divf %14, %15 : vector<8x1xf32>
    %17 = vector.broadcast %9 : vector<8x1xf32> to vector<8x32xf32>
    %18 = arith.subf %1, %17 : vector<8x32xf32>
    %cst_9 = arith.constant 9.99999974E-6 : f32
    %19 = vector.broadcast %cst_9 : f32 to vector<8x1xf32>
    %20 = arith.addf %16, %19 : vector<8x1xf32>
    %21 = math.rsqrt %20 : vector<8x1xf32>
    %22 = vector.broadcast %21 : vector<8x1xf32> to vector<8x32xf32>
    %23 = arith.mulf %18, %22 : vector<8x32xf32>
    %24 = vector.shape_cast %3 : vector<32xf32> to vector<1x32xf32>
    %25 = vector.broadcast %24 : vector<1x32xf32> to vector<8x32xf32>
    %26 = arith.mulf %23, %25 : vector<8x32xf32>
    %27 = vector.shape_cast %5 : vector<32xf32> to vector<1x32xf32>
    %28 = vector.broadcast %27 : vector<1x32xf32> to vector<8x32xf32>
    %29 = arith.addf %26, %28 : vector<8x32xf32>
    %30 = arith.truncf %29 : vector<8x32xf32> to vector<8x32xbf16>
    %c0_10 = arith.constant 0 : index
    %c0_11 = arith.constant 0 : index
    %31 = vector.load %arg4[%c0_10, %c0_11] : memref<32x96xbf16, #tpu.memory_space<vmem>>, vector<32x96xbf16>
    %cst_12 = arith.constant dense<0.000000e+00> : vector<8x96xf32>
    %32 = tpu.matmul %30, %31, %cst_12 {dimension_numbers = #tpu.dot_dimension_numbers<[1], [0], [0], [1], [0, 0, 1, 1], [], []>} : vector<8x32xbf16>, vector<32x96xbf16>, vector<8x96xf32> -> vector<8x96xf32>
    %c0_13 = arith.constant 0 : index
    %c0_14 = arith.constant 0 : index
    %33 = vector.load %arg5[%c0_13, %c0_14] : memref<1x96xf32, #tpu.memory_space<vmem>>, vector<1x96xf32>
    %34 = vector.shape_cast %33 : vector<1x96xf32> to vector<96xf32>
    %35 = vector.shape_cast %34 : vector<96xf32> to vector<1x96xf32>
    %36 = vector.broadcast %35 : vector<1x96xf32> to vector<8x96xf32>
    %37 = arith.addf %32, %36 : vector<8x96xf32>
    %38 = vector.extract_strided_slice %37 {offsets = [0, 0], sizes = [8, 32], strides = [1, 1]} : vector<8x96xf32> to vector<8x32xf32>
    %39 = vector.extract_strided_slice %37 {offsets = [0, 32], sizes = [8, 32], strides = [1, 1]} : vector<8x96xf32> to vector<8x32xf32>
    %40 = vector.extract_strided_slice %37 {offsets = [0, 64], sizes = [8, 32], strides = [1, 1]} : vector<8x96xf32> to vector<8x32xf32>
    %c0_15 = arith.constant 0 : index
    %c0_16 = arith.constant 0 : index
    %c0_17 = arith.constant 0 : index
    %41 = vector.load %arg15[%c0_15, %c0_16, %c0_17] : memref<1x8x32xf32, #tpu.memory_space<vmem>>, vector<1x8x32xf32>
    %42 = vector.shape_cast %41 : vector<1x8x32xf32> to vector<8x32xf32>
    %43 = vector.shape_cast %39 : vector<8x32xf32> to vector<1x8x32xf32>
    tpu.vector_store %arg15[%c0_15, %c0_16, %c0_17], %43 {strides = array<i32>} : memref<1x8x32xf32, #tpu.memory_space<vmem>>, vector<1x8x32xf32>,
    %c0_18 = arith.constant 0 : index
    %c0_19 = arith.constant 0 : index
    %c0_20 = arith.constant 0 : index
    %44 = vector.load %arg16[%c0_18, %c0_19, %c0_20] : memref<1x8x32xf32, #tpu.memory_space<vmem>>, vector<1x8x32xf32>
    %45 = vector.shape_cast %44 : vector<1x8x32xf32> to vector<8x32xf32>
    %46 = vector.shape_cast %40 : vector<8x32xf32> to vector<1x8x32xf32>
    tpu.vector_store %arg16[%c0_18, %c0_19, %c0_20], %46 {strides = array<i32>} : memref<1x8x32xf32, #tpu.memory_space<vmem>>, vector<1x8x32xf32>,
    %47 = tpu.iota {dimensions = array<i32: 0>} : vector<8x8xi32>
    %48 = tpu.iota {dimensions = array<i32: 1>} : vector<8x8xi32>
    %49 = arith.cmpi sle, %48, %47 : vector<8x8xi32>
    %50 = vector.extract_strided_slice %38 {offsets = [0, 0], sizes = [8, 8], strides = [1, 1]} : vector<8x32xf32> to vector<8x8xf32>
    %51 = arith.truncf %50 : vector<8x8xf32> to vector<8x8xbf16>
    %52 = vector.extract_strided_slice %39 {offsets = [0, 0], sizes = [8, 8], strides = [1, 1]} : vector<8x32xf32> to vector<8x8xf32>
    %53 = arith.truncf %52 : vector<8x8xf32> to vector<8x8xbf16>
    %54 = vector.extract_strided_slice %40 {offsets = [0, 0], sizes = [8, 8], strides = [1, 1]} : vector<8x32xf32> to vector<8x8xf32>
    %55 = arith.truncf %54 : vector<8x8xf32> to vector<8x8xbf16>
    %cst_21 = arith.constant dense<0.000000e+00> : vector<8x8xf32>
    %56 = tpu.matmul %51, %53, %cst_21 {dimension_numbers = #tpu.dot_dimension_numbers<[1], [1], [0], [0], [0, 0, 1, 0], [], []>} : vector<8x8xbf16>, vector<8x8xbf16>, vector<8x8xf32> -> vector<8x8xf32>
    %cst_22 = arith.constant 0.353553385 : f32
    %57 = vector.broadcast %cst_22 : f32 to vector<8x8xf32>
    %58 = arith.mulf %56, %57 : vector<8x8xf32>
    %cst_23 = arith.constant -1.000000e+04 : f32
    %59 = vector.broadcast %cst_23 : f32 to vector<8x8xf32>
    %60 = arith.select %49, %58, %59 : vector<8x8xi1>, vector<8x8xf32>
    %cst_24 = arith.constant dense<0xFF800000> : vector<8xf32>
    %61 = vector.multi_reduction <maximumf>, %60, %cst_24 [1] : vector<8x8xf32> to vector<8xf32>
    %62 = vector.shape_cast %61 : vector<8xf32> to vector<8x1xf32>
    %63 = vector.broadcast %62 : vector<8x1xf32> to vector<8x8xf32>
    %64 = arith.subf %60, %63 : vector<8x8xf32>
    %65 = math.exp %64 : vector<8x8xf32>
    %cst_25 = arith.constant dense<0.000000e+00> : vector<8xf32>
    %66 = vector.multi_reduction <add>, %65, %cst_25 [1] : vector<8x8xf32> to vector<8xf32>
    %67 = vector.shape_cast %66 : vector<8xf32> to vector<8x1xf32>
    %68 = tpu.reciprocal %67 {approx = true} : vector<8x1xf32> -> vector<8x1xf32>
    %69 = vector.broadcast %68 : vector<8x1xf32> to vector<8x8xf32>
    %70 = arith.mulf %65, %69 : vector<8x8xf32>
    %71 = arith.truncf %70 : vector<8x8xf32> to vector<8x8xbf16>
    %cst_26 = arith.constant dense<0.000000e+00> : vector<8x8xf32>
    %72 = tpu.matmul %71, %55, %cst_26 {dimension_numbers = #tpu.dot_dimension_numbers<[1], [0], [0], [1], [0, 0, 1, 1], [], []>} : vector<8x8xbf16>, vector<8x8xbf16>, vector<8x8xf32> -> vector<8x8xf32>
    %c0_27 = arith.constant 0 : index
    %c0_28 = arith.constant 0 : index
    %73 = vector.load %arg17[%c0_27, %c0_28] : memref<8x32xf32, #tpu.memory_space<vmem>>, vector<8x8xf32>
    tpu.vector_store %arg17[%c0_27, %c0_28], %72 {strides = array<i32>} : memref<8x32xf32, #tpu.memory_space<vmem>>, vector<8x8xf32>,
    %74 = vector.extract_strided_slice %38 {offsets = [0, 8], sizes = [8, 8], strides = [1, 1]} : vector<8x32xf32> to vector<8x8xf32>
    %75 = arith.truncf %74 : vector<8x8xf32> to vector<8x8xbf16>
    %76 = vector.extract_strided_slice %39 {offsets = [0, 8], sizes = [8, 8], strides = [1, 1]} : vector<8x32xf32> to vector<8x8xf32>
    %77 = arith.truncf %76 : vector<8x8xf32> to vector<8x8xbf16>
    %78 = vector.extract_strided_slice %40 {offsets = [0, 8], sizes = [8, 8], strides = [1, 1]} : vector<8x32xf32> to vector<8x8xf32>
    %79 = arith.truncf %78 : vector<8x8xf32> to vector<8x8xbf16>
    %cst_29 = arith.constant dense<0.000000e+00> : vector<8x8xf32>
    %80 = tpu.matmul %75, %77, %cst_29 {dimension_numbers = #tpu.dot_dimension_numbers<[1], [1], [0], [0], [0, 0, 1, 0], [], []>} : vector<8x8xbf16>, vector<8x8xbf16>, vector<8x8xf32> -> vector<8x8xf32>
    %cst_30 = arith.constant 0.353553385 : f32
    %81 = vector.broadcast %cst_30 : f32 to vector<8x8xf32>
    %82 = arith.mulf %80, %81 : vector<8x8xf32>
    %cst_31 = arith.constant -1.000000e+04 : f32
    %83 = vector.broadcast %cst_31 : f32 to vector<8x8xf32>
    %84 = arith.select %49, %82, %83 : vector<8x8xi1>, vector<8x8xf32>
    %cst_32 = arith.constant dense<0xFF800000> : vector<8xf32>
    %85 = vector.multi_reduction <maximumf>, %84, %cst_32 [1] : vector<8x8xf32> to vector<8xf32>
    %86 = vector.shape_cast %85 : vector<8xf32> to vector<8x1xf32>
    %87 = vector.broadcast %86 : vector<8x1xf32> to vector<8x8xf32>
    %88 = arith.subf %84, %87 : vector<8x8xf32>
    %89 = math.exp %88 : vector<8x8xf32>
    %cst_33 = arith.constant dense<0.000000e+00> : vector<8xf32>
    %90 = vector.multi_reduction <add>, %89, %cst_33 [1] : vector<8x8xf32> to vector<8xf32>
    %91 = vector.shape_cast %90 : vector<8xf32> to vector<8x1xf32>
    %92 = tpu.reciprocal %91 {approx = true} : vector<8x1xf32> -> vector<8x1xf32>
    %93 = vector.broadcast %92 : vector<8x1xf32> to vector<8x8xf32>
    %94 = arith.mulf %89, %93 : vector<8x8xf32>
    %95 = arith.truncf %94 : vector<8x8xf32> to vector<8x8xbf16>
    %cst_34 = arith.constant dense<0.000000e+00> : vector<8x8xf32>
    %96 = tpu.matmul %95, %79, %cst_34 {dimension_numbers = #tpu.dot_dimension_numbers<[1], [0], [0], [1], [0, 0, 1, 1], [], []>} : vector<8x8xbf16>, vector<8x8xbf16>, vector<8x8xf32> -> vector<8x8xf32>
    %c0_35 = arith.constant 0 : index
    %c8 = arith.constant 8 : index
    %97 = vector.load %arg17[%c0_35, %c8] : memref<8x32xf32, #tpu.memory_space<vmem>>, vector<8x8xf32>
    tpu.vector_store %arg17[%c0_35, %c8], %96 {strides = array<i32>} : memref<8x32xf32, #tpu.memory_space<vmem>>, vector<8x8xf32>,
    %98 = vector.extract_strided_slice %38 {offsets = [0, 16], sizes = [8, 8], strides = [1, 1]} : vector<8x32xf32> to vector<8x8xf32>
    %99 = arith.truncf %98 : vector<8x8xf32> to vector<8x8xbf16>
    %100 = vector.extract_strided_slice %39 {offsets = [0, 16], sizes = [8, 8], strides = [1, 1]} : vector<8x32xf32> to vector<8x8xf32>
    %101 = arith.truncf %100 : vector<8x8xf32> to vector<8x8xbf16>
    %102 = vector.extract_strided_slice %40 {offsets = [0, 16], sizes = [8, 8], strides = [1, 1]} : vector<8x32xf32> to vector<8x8xf32>
    %103 = arith.truncf %102 : vector<8x8xf32> to vector<8x8xbf16>
    %cst_36 = arith.constant dense<0.000000e+00> : vector<8x8xf32>
    %104 = tpu.matmul %99, %101, %cst_36 {dimension_numbers = #tpu.dot_dimension_numbers<[1], [1], [0], [0], [0, 0, 1, 0], [], []>} : vector<8x8xbf16>, vector<8x8xbf16>, vector<8x8xf32> -> vector<8x8xf32>
    %cst_37 = arith.constant 0.353553385 : f32
    %105 = vector.broadcast %cst_37 : f32 to vector<8x8xf32>
    %106 = arith.mulf %104, %105 : vector<8x8xf32>
    %cst_38 = arith.constant -1.000000e+04 : f32
    %107 = vector.broadcast %cst_38 : f32 to vector<8x8xf32>
    %108 = arith.select %49, %106, %107 : vector<8x8xi1>, vector<8x8xf32>
    %cst_39 = arith.constant dense<0xFF800000> : vector<8xf32>
    %109 = vector.multi_reduction <maximumf>, %108, %cst_39 [1] : vector<8x8xf32> to vector<8xf32>
    %110 = vector.shape_cast %109 : vector<8xf32> to vector<8x1xf32>
    %111 = vector.broadcast %110 : vector<8x1xf32> to vector<8x8xf32>
    %112 = arith.subf %108, %111 : vector<8x8xf32>
    %113 = math.exp %112 : vector<8x8xf32>
    %cst_40 = arith.constant dense<0.000000e+00> : vector<8xf32>
    %114 = vector.multi_reduction <add>, %113, %cst_40 [1] : vector<8x8xf32> to vector<8xf32>
    %115 = vector.shape_cast %114 : vector<8xf32> to vector<8x1xf32>
    %116 = tpu.reciprocal %115 {approx = true} : vector<8x1xf32> -> vector<8x1xf32>
    %117 = vector.broadcast %116 : vector<8x1xf32> to vector<8x8xf32>
    %118 = arith.mulf %113, %117 : vector<8x8xf32>
    %119 = arith.truncf %118 : vector<8x8xf32> to vector<8x8xbf16>
    %cst_41 = arith.constant dense<0.000000e+00> : vector<8x8xf32>
    %120 = tpu.matmul %119, %103, %cst_41 {dimension_numbers = #tpu.dot_dimension_numbers<[1], [0], [0], [1], [0, 0, 1, 1], [], []>} : vector<8x8xbf16>, vector<8x8xbf16>, vector<8x8xf32> -> vector<8x8xf32>
    %c0_42 = arith.constant 0 : index
    %c16 = arith.constant 16 : index
    %121 = vector.load %arg17[%c0_42, %c16] : memref<8x32xf32, #tpu.memory_space<vmem>>, vector<8x8xf32>
    tpu.vector_store %arg17[%c0_42, %c16], %120 {strides = array<i32>} : memref<8x32xf32, #tpu.memory_space<vmem>>, vector<8x8xf32>,
    %122 = vector.extract_strided_slice %38 {offsets = [0, 24], sizes = [8, 8], strides = [1, 1]} : vector<8x32xf32> to vector<8x8xf32>
    %123 = arith.truncf %122 : vector<8x8xf32> to vector<8x8xbf16>
    %124 = vector.extract_strided_slice %39 {offsets = [0, 24], sizes = [8, 8], strides = [1, 1]} : vector<8x32xf32> to vector<8x8xf32>
    %125 = arith.truncf %124 : vector<8x8xf32> to vector<8x8xbf16>
    %126 = vector.extract_strided_slice %40 {offsets = [0, 24], sizes = [8, 8], strides = [1, 1]} : vector<8x32xf32> to vector<8x8xf32>
    %127 = arith.truncf %126 : vector<8x8xf32> to vector<8x8xbf16>
    %cst_43 = arith.constant dense<0.000000e+00> : vector<8x8xf32>
    %128 = tpu.matmul %123, %125, %cst_43 {dimension_numbers = #tpu.dot_dimension_numbers<[1], [1], [0], [0], [0, 0, 1, 0], [], []>} : vector<8x8xbf16>, vector<8x8xbf16>, vector<8x8xf32> -> vector<8x8xf32>
    %cst_44 = arith.constant 0.353553385 : f32
    %129 = vector.broadcast %cst_44 : f32 to vector<8x8xf32>
    %130 = arith.mulf %128, %129 : vector<8x8xf32>
    %cst_45 = arith.constant -1.000000e+04 : f32
    %131 = vector.broadcast %cst_45 : f32 to vector<8x8xf32>
    %132 = arith.select %49, %130, %131 : vector<8x8xi1>, vector<8x8xf32>
    %cst_46 = arith.constant dense<0xFF800000> : vector<8xf32>
    %133 = vector.multi_reduction <maximumf>, %132, %cst_46 [1] : vector<8x8xf32> to vector<8xf32>
    %134 = vector.shape_cast %133 : vector<8xf32> to vector<8x1xf32>
    %135 = vector.broadcast %134 : vector<8x1xf32> to vector<8x8xf32>
    %136 = arith.subf %132, %135 : vector<8x8xf32>
    %137 = math.exp %136 : vector<8x8xf32>
    %cst_47 = arith.constant dense<0.000000e+00> : vector<8xf32>
    %138 = vector.multi_reduction <add>, %137, %cst_47 [1] : vector<8x8xf32> to vector<8xf32>
    %139 = vector.shape_cast %138 : vector<8xf32> to vector<8x1xf32>
    %140 = tpu.reciprocal %139 {approx = true} : vector<8x1xf32> -> vector<8x1xf32>
    %141 = vector.broadcast %140 : vector<8x1xf32> to vector<8x8xf32>
    %142 = arith.mulf %137, %141 : vector<8x8xf32>
    %143 = arith.truncf %142 : vector<8x8xf32> to vector<8x8xbf16>
    %cst_48 = arith.constant dense<0.000000e+00> : vector<8x8xf32>
    %144 = tpu.matmul %143, %127, %cst_48 {dimension_numbers = #tpu.dot_dimension_numbers<[1], [0], [0], [1], [0, 0, 1, 1], [], []>} : vector<8x8xbf16>, vector<8x8xbf16>, vector<8x8xf32> -> vector<8x8xf32>
    %c0_49 = arith.constant 0 : index
    %c24 = arith.constant 24 : index
    %145 = vector.load %arg17[%c0_49, %c24] : memref<8x32xf32, #tpu.memory_space<vmem>>, vector<8x8xf32>
    tpu.vector_store %arg17[%c0_49, %c24], %144 {strides = array<i32>} : memref<8x32xf32, #tpu.memory_space<vmem>>, vector<8x8xf32>,
    %c0_50 = arith.constant 0 : index
    %c0_51 = arith.constant 0 : index
    %146 = vector.load %arg17[%c0_50, %c0_51] : memref<8x32xf32, #tpu.memory_space<vmem>>, vector<8x32xf32>
    %147 = arith.truncf %146 : vector<8x32xf32> to vector<8x32xbf16>
    %c0_52 = arith.constant 0 : index
    %c0_53 = arith.constant 0 : index
    %148 = vector.load %arg6[%c0_52, %c0_53] : memref<32x32xbf16, #tpu.memory_space<vmem>>, vector<32x32xbf16>
    %cst_54 = arith.constant dense<0.000000e+00> : vector<8x32xf32>
    %149 = tpu.matmul %147, %148, %cst_54 {dimension_numbers = #tpu.dot_dimension_numbers<[1], [0], [0], [1], [0, 0, 1, 1], [], []>} : vector<8x32xbf16>, vector<32x32xbf16>, vector<8x32xf32> -> vector<8x32xf32>
    %c0_55 = arith.constant 0 : index
    %c0_56 = arith.constant 0 : index
    %150 = vector.load %arg7[%c0_55, %c0_56] : memref<1x32xf32, #tpu.memory_space<vmem>>, vector<1x32xf32>
    %151 = vector.shape_cast %150 : vector<1x32xf32> to vector<32xf32>
    %152 = vector.shape_cast %151 : vector<32xf32> to vector<1x32xf32>
    %153 = vector.broadcast %152 : vector<1x32xf32> to vector<8x32xf32>
    %154 = arith.addf %149, %153 : vector<8x32xf32>
    %155 = arith.addf %1, %154 : vector<8x32xf32>
    %c0_57 = arith.constant 0 : index
    %c0_58 = arith.constant 0 : index
    %156 = vector.load %arg8[%c0_57, %c0_58] : memref<1x32xf32, #tpu.memory_space<vmem>>, vector<1x32xf32>
    %157 = vector.shape_cast %156 : vector<1x32xf32> to vector<32xf32>
    %c0_59 = arith.constant 0 : index
    %c0_60 = arith.constant 0 : index
    %158 = vector.load %arg9[%c0_59, %c0_60] : memref<1x32xf32, #tpu.memory_space<vmem>>, vector<1x32xf32>
    %159 = vector.shape_cast %158 : vector<1x32xf32> to vector<32xf32>
    %cst_61 = arith.constant dense<0.000000e+00> : vector<8xf32>
    %160 = vector.multi_reduction <add>, %155, %cst_61 [1] : vector<8x32xf32> to vector<8xf32>
    %161 = vector.shape_cast %160 : vector<8xf32> to vector<8x1xf32>
    %cst_62 = arith.constant 3.200000e+01 : f32
    %162 = vector.broadcast %cst_62 : f32 to vector<8x1xf32>
    %163 = arith.divf %161, %162 : vector<8x1xf32>
    %164 = vector.broadcast %163 : vector<8x1xf32> to vector<8x32xf32>
    %165 = arith.subf %155, %164 : vector<8x32xf32>
    %166 = arith.mulf %165, %165 : vector<8x32xf32>
    %cst_63 = arith.constant dense<0.000000e+00> : vector<8xf32>
    %167 = vector.multi_reduction <add>, %166, %cst_63 [1] : vector<8x32xf32> to vector<8xf32>
    %168 = vector.shape_cast %167 : vector<8xf32> to vector<8x1xf32>
    %cst_64 = arith.constant 3.200000e+01 : f32
    %169 = vector.broadcast %cst_64 : f32 to vector<8x1xf32>
    %170 = arith.divf %168, %169 : vector<8x1xf32>
    %171 = vector.broadcast %163 : vector<8x1xf32> to vector<8x32xf32>
    %172 = arith.subf %155, %171 : vector<8x32xf32>
    %cst_65 = arith.constant 9.99999974E-6 : f32
    %173 = vector.broadcast %cst_65 : f32 to vector<8x1xf32>
    %174 = arith.addf %170, %173 : vector<8x1xf32>
    %175 = math.rsqrt %174 : vector<8x1xf32>
    %176 = vector.broadcast %175 : vector<8x1xf32> to vector<8x32xf32>
    %177 = arith.mulf %172, %176 : vector<8x32xf32>
    %178 = vector.shape_cast %157 : vector<32xf32> to vector<1x32xf32>
    %179 = vector.broadcast %178 : vector<1x32xf32> to vector<8x32xf32>
    %180 = arith.mulf %177, %179 : vector<8x32xf32>
    %181 = vector.shape_cast %159 : vector<32xf32> to vector<1x32xf32>
    %182 = vector.broadcast %181 : vector<1x32xf32> to vector<8x32xf32>
    %183 = arith.addf %180, %182 : vector<8x32xf32>
    %184 = arith.truncf %183 : vector<8x32xf32> to vector<8x32xbf16>
    %c0_66 = arith.constant 0 : index
    %c0_67 = arith.constant 0 : index
    %185 = vector.load %arg10[%c0_66, %c0_67] : memref<32x128xbf16, #tpu.memory_space<vmem>>, vector<32x128xbf16>
    %cst_68 = arith.constant dense<0.000000e+00> : vector<8x128xf32>
    %186 = tpu.matmul %184, %185, %cst_68 {dimension_numbers = #tpu.dot_dimension_numbers<[1], [0], [0], [1], [0, 0, 1, 1], [], []>} : vector<8x32xbf16>, vector<32x128xbf16>, vector<8x128xf32> -> vector<8x128xf32>
    %c0_69 = arith.constant 0 : index
    %c0_70 = arith.constant 0 : index
    %187 = vector.load %arg11[%c0_69, %c0_70] : memref<1x128xf32, #tpu.memory_space<vmem>>, vector<1x128xf32>
    %188 = vector.shape_cast %187 : vector<1x128xf32> to vector<128xf32>
    %189 = vector.shape_cast %188 : vector<128xf32> to vector<1x128xf32>
    %190 = vector.broadcast %189 : vector<1x128xf32> to vector<8x128xf32>
    %191 = arith.addf %186, %190 : vector<8x128xf32>
    %cst_71 = arith.constant 5.000000e-01 : f32
    %192 = vector.broadcast %cst_71 : f32 to vector<8x128xf32>
    %193 = arith.mulf %192, %191 : vector<8x128xf32>
    %194 = arith.mulf %191, %191 : vector<8x128xf32>
    %195 = arith.mulf %191, %194 : vector<8x128xf32>
    %cst_72 = arith.constant 4.471500e-02 : f32
    %196 = vector.broadcast %cst_72 : f32 to vector<8x128xf32>
    %197 = arith.mulf %196, %195 : vector<8x128xf32>
    %198 = arith.addf %191, %197 : vector<8x128xf32>
    %cst_73 = arith.constant 0.797884583 : f32
    %199 = vector.broadcast %cst_73 : f32 to vector<8x128xf32>
    %200 = arith.mulf %199, %198 : vector<8x128xf32>
    %201 = math.tanh %200 : vector<8x128xf32>
    %cst_74 = arith.constant 1.000000e+00 : f32
    %202 = vector.broadcast %cst_74 : f32 to vector<8x128xf32>
    %203 = arith.addf %202, %201 : vector<8x128xf32>
    %204 = arith.mulf %193, %203 : vector<8x128xf32>
    %205 = arith.truncf %204 : vector<8x128xf32> to vector<8x128xbf16>
    %c0_75 = arith.constant 0 : index
    %c0_76 = arith.constant 0 : index
    %206 = vector.load %arg12[%c0_75, %c0_76] : memref<128x32xbf16, #tpu.memory_space<vmem>>, vector<128x32xbf16>
    %cst_77 = arith.constant dense<0.000000e+00> : vector<8x32xf32>
    %207 = tpu.matmul %205, %206, %cst_77 {dimension_numbers = #tpu.dot_dimension_numbers<[1], [0], [0], [1], [0, 0, 1, 1], [], []>} : vector<8x128xbf16>, vector<128x32xbf16>, vector<8x32xf32> -> vector<8x32xf32>
    %c0_78 = arith.constant 0 : index
    %c0_79 = arith.constant 0 : index
    %208 = vector.load %arg13[%c0_78, %c0_79] : memref<1x32xf32, #tpu.memory_space<vmem>>, vector<1x32xf32>
    %209 = vector.shape_cast %208 : vector<1x32xf32> to vector<32xf32>
    %210 = vector.shape_cast %209 : vector<32xf32> to vector<1x32xf32>
    %211 = vector.broadcast %210 : vector<1x32xf32> to vector<8x32xf32>
    %212 = arith.addf %207, %211 : vector<8x32xf32>
    %213 = arith.addf %155, %212 : vector<8x32xf32>
    %c0_80 = arith.constant 0 : index
    %c0_81 = arith.constant 0 : index
    %c0_82 = arith.constant 0 : index
    %214 = vector.load %arg14[%c0_80, %c0_81, %c0_82] : memref<1x8x32xf32, #tpu.memory_space<vmem>>, vector<1x8x32xf32>
    %215 = vector.shape_cast %214 : vector<1x8x32xf32> to vector<8x32xf32>
    %216 = vector.shape_cast %213 : vector<8x32xf32> to vector<1x8x32xf32>
    tpu.vector_store %arg14[%c0_80, %c0_81, %c0_82], %216 {strides = array<i32>} : memref<1x8x32xf32, #tpu.memory_space<vmem>>, vector<1x8x32xf32>,
    return
  }
  func.func @transform_0(%arg0: i32) -> (i32, i32, i32) {
    %c0_i32 = arith.constant 0 : i32
    %c0_i32_0 = arith.constant 0 : i32
    %c0_i32_1 = arith.constant 0 : i32
    return %arg0, %c0_i32, %c0_i32_0 : i32, i32, i32
  }
  func.func @transform_1(%arg0: i32) -> (i32, i32) {
    %c0_i32 = arith.constant 0 : i32
    %c0_i32_0 = arith.constant 0 : i32
    %c0_i32_1 = arith.constant 0 : i32
    return %c0_i32, %c0_i32_0 : i32, i32
  }
  func.func @transform_2(%arg0: i32) -> (i32, i32) {
    %c0_i32 = arith.constant 0 : i32
    %c0_i32_0 = arith.constant 0 : i32
    %c0_i32_1 = arith.constant 0 : i32
    return %c0_i32, %c0_i32_0 : i32, i32
  }
  func.func @transform_3(%arg0: i32) -> (i32, i32) {
    %c0_i32 = arith.constant 0 : i32
    %c0_i32_0 = arith.constant 0 : i32
    %c0_i32_1 = arith.constant 0 : i32
    return %c0_i32, %c0_i32_0 : i32, i32
  }
  func.func @transform_4(%arg0: i32) -> (i32, i32) {
    %c0_i32 = arith.constant 0 : i32
    %c0_i32_0 = arith.constant 0 : i32
    %c0_i32_1 = arith.constant 0 : i32
    return %c0_i32, %c0_i32_0 : i32, i32
  }
  func.func @transform_5(%arg0: i32) -> (i32, i32) {
    %c0_i32 = arith.constant 0 : i32
    %c0_i32_0 = arith.constant 0 : i32
    %c0_i32_1 = arith.constant 0 : i32
    return %c0_i32, %c0_i32_0 : i32, i32
  }
  func.func @transform_6(%arg0: i32) -> (i32, i32) {
    %c0_i32 = arith.constant 0 : i32
    %c0_i32_0 = arith.constant 0 : i32
    %c0_i32_1 = arith.constant 0 : i32
    return %c0_i32, %c0_i32_0 : i32, i32
  }
  func.func @transform_7(%arg0: i32) -> (i32, i32) {
    %c0_i32 = arith.constant 0 : i32
    %c0_i32_0 = arith.constant 0 : i32
    %c0_i32_1 = arith.constant 0 : i32
    return %c0_i32, %c0_i32_0 : i32, i32
  }
  func.func @transform_8(%arg0: i32) -> (i32, i32) {
    %c0_i32 = arith.constant 0 : i32
    %c0_i32_0 = arith.constant 0 : i32
    %c0_i32_1 = arith.constant 0 : i32
    return %c0_i32, %c0_i32_0 : i32, i32
  }
  func.func @transform_9(%arg0: i32) -> (i32, i32) {
    %c0_i32 = arith.constant 0 : i32
    %c0_i32_0 = arith.constant 0 : i32
    %c0_i32_1 = arith.constant 0 : i32
    return %c0_i32, %c0_i32_0 : i32, i32
  }
  func.func @transform_10(%arg0: i32) -> (i32, i32) {
    %c0_i32 = arith.constant 0 : i32
    %c0_i32_0 = arith.constant 0 : i32
    %c0_i32_1 = arith.constant 0 : i32
    return %c0_i32, %c0_i32_0 : i32, i32
  }
  func.func @transform_11(%arg0: i32) -> (i32, i32) {
    %c0_i32 = arith.constant 0 : i32
    %c0_i32_0 = arith.constant 0 : i32
    %c0_i32_1 = arith.constant 0 : i32
    return %c0_i32, %c0_i32_0 : i32, i32
  }
  func.func @transform_12(%arg0: i32) -> (i32, i32) {
    %c0_i32 = arith.constant 0 : i32
    %c0_i32_0 = arith.constant 0 : i32
    %c0_i32_1 = arith.constant 0 : i32
    return %c0_i32, %c0_i32_0 : i32, i32
  }
  func.func @transform_13(%arg0: i32) -> (i32, i32, i32) {
    %c0_i32 = arith.constant 0 : i32
    %c0_i32_0 = arith.constant 0 : i32
    %c0_i32_1 = arith.constant 0 : i32
    return %arg0, %c0_i32, %c0_i32_0 : i32, i32, i32
  }
  func.func @transform_14(%arg0: i32) -> (i32, i32, i32) {
    %c0_i32 = arith.constant 0 : i32
    %c0_i32_0 = arith.constant 0 : i32
    %c0_i32_1 = arith.constant 0 : i32
    return %arg0, %c0_i32, %c0_i32_0 : i32, i32, i32
  }
  func.func @transform_15(%arg0: i32) -> (i32, i32, i32) {
    %c0_i32 = arith.constant 0 : i32
    %c0_i32_0 = arith.constant 0 : i32
    %c0_i32_1 = arith.constant 0 : i32
    return %arg0, %c0_i32, %c0_i32_0 : i32, i32, i32
  }
}

</mosaic_0001>

<bundles_post_ra>
// kernel: tpu_custom_call.1
= control target key start
LH: loop header
LB: loop body
LE: loop exit
PB: predicated region body
PF: predicated region fallthrough
CT: control target
= control target key end

     0   :  { %s3556_s0 = inlined_call_operand.hbm [shape: f32[2,8,32], index: 0, kind: input, shape index: {}]   ;;  %s3557_s1 = inlined_call_operand.hbm [shape: f32[1,32], index: 1, kind: input, shape index: {}]   ;;  %s3558_s2 = inlined_call_operand.hbm [shape: f32[1,32], index: 2, kind: input, shape index: {}]   ;;  %s3559_s3 = inlined_call_operand.hbm [shape: bf16[32,96], index: 3, kind: input, shape index: {}]   ;;  %s3560_s4 = inlined_call_operand.hbm [shape: f32[1,96], index: 4, kind: input, shape index: {}]   ;;  %s3561_s5 = inlined_call_operand.hbm [shape: bf16[32,32], index: 5, kind: input, shape index: {}]   ;;  %s3562_s6 = inlined_call_operand.hbm [shape: f32[1,32], index: 6, kind: input, shape index: {}]   ;;  %s3563_s7 = inlined_call_operand.hbm [shape: f32[1,32], index: 7, kind: input, shape index: {}]   ;;  %s3564_s8 = inlined_call_operand.hbm [shape: f32[1,32], index: 8, kind: input, shape index: {}]   ;;  %s3565_s9 = inlined_call_operand.hbm [shape: bf16[32,128], index: 9, kind: input, shape index: {}]   ;;  %s3566_s10 = inlined_call_operand.hbm [shape: f32[1,128], index: 10, kind: input, shape index: {}]   ;;  %s3567_s11 = inlined_call_operand.hbm [shape: bf16[128,32], index: 11, kind: input, shape index: {}]   ;;  %s3568_s12 = inlined_call_operand.hbm [shape: f32[1,32], index: 12, kind: input, shape index: {}]   ;;  %s3569_s13 = inlined_call_operand.hbm [shape: f32[2,8,32], index: 13, kind: output, shape index: {0}]   ;;  %s3570_s14 = inlined_call_operand.hbm [shape: f32[2,8,32], index: 14, kind: output, shape index: {1}]   ;;  %s3571_s15 = inlined_call_operand.hbm [shape: f32[2,8,32], index: 15, kind: output, shape index: {2}]  }
   0x1   :  { %3585 = sst [smem:[#allocation39_spill]] %s3556_s0 }
   0x2   :  { %3586 = sst [smem:[#allocation40_spill]] %s3557_s1 }
   0x3   :  { %3587 = sst [smem:[#allocation41_spill]] %s3558_s2 }
   0x4   :  { %3588 = sst [smem:[#allocation42_spill]] %s3559_s3 }
   0x5   :  { %3589 = sst [smem:[#allocation43_spill]] %s3560_s4 }
   0x6   :  { %3590 = sst [smem:[#allocation44_spill]] %s3561_s5 }
   0x7   :  { %3591 = sst [smem:[#allocation45_spill]] %s3562_s6 }
   0x8   :  { %3592 = sst [smem:[#allocation46_spill]] %s3563_s7 }
   0x9   :  { %3593 = sst [smem:[#allocation47_spill]] %s3569_s13 }
   0xa   :  { %3594 = sst [smem:[#allocation48_spill]] %s3570_s14 }
   0xb   :  { %3595 = sst [smem:[#allocation49_spill]] %s3571_s15 }
   0xc   :  { %21 = vsyncpa [#allocation4], 0 }
   0xd   :  { %23 = vsyncpa [#allocation4 + $0x1], 0 }
   0xe   :  { %24 = vsyncpa [#allocation7], 0 }
   0xf   :  { %25 = vsyncpa [#allocation10], 0 }
  0x10   :  { %26 = vsyncpa [#allocation13], 0 }
  0x11   :  { %27 = vsyncpa [#allocation16], 0 }
  0x12   :  { %28 = vsyncpa [#allocation19], 0 }
  0x13   :  { %29 = vsyncpa [#allocation22], 0 }
  0x14   :  { %30 = vsyncpa [#allocation5], 0 }
  0x15   :  { %32 = vsyncpa [#allocation5 + $0x1], 0 }
  0x16   :  { %33 = vsyncpa [#allocation26], 0 }
  0x17   :  { %35 = vsyncpa [#allocation26 + $0x1], 0  ;;  %s2916_s18 = smov 0   ;;  %s2918_s19 = smov 0  }
  0x18   :  { %s2920_s20 = smov 0   ;;  %s2922_s21 = smov 0  }
  0x19 LB: > { %s2802_s22 = smov [#allocation6]   ;;  %s2937_s24 = sadd.s32 4294967295, %s2800_s21   ;;  %s2800_s21 = sphi %s2922_s21, %s3641_s21   ;;  %s2796_s20 = sphi %s2920_s20, %s3640_s20   ;;  %s2792_s19 = sphi %s2918_s19, %s3639_s19   ;;  %s2788_s18 = sphi %s2916_s18, %s3638_s18  }
  0x1a   : > { %s415_s23 = sshll.u32 %s2802_s22, 4  ;;  %3596 = sst [smem:[#allocation37_spill]] %s2937_s24  ;;  %s2942_s23 = int_to_ptr.vmem [resolvable:$true] %s415_s23 }
  0x1b   : > { %p1853_p0 = scmp.ge.s32.totalorder %s2800_s21, 1  ;;  %p3580_p1 = scmp.eq.s32.totalorder %s2937_s24, 0 }
  0x1c   : > { %p402_p2 = scmp.lt.s32.totalorder %s2800_s21, 3  ;;  %s2803_s26 = smov [#allocation9]  }
  0x1d   : > { %s436_s27 = sshll.u32 %s2803_s26, 4  ;;  %s2804_s29 = smov [#allocation12]   ;;  %s2951_s27 = int_to_ptr.vmem [resolvable:$true] %s436_s27 }
  0x1e   : > { %p2944_p3 = pnand %p1853_p0, %p402_p2  ;;  %s460_s30 = sshll.u32 %s2804_s29, 4  ;;  %s2959_s30 = int_to_ptr.vmem [resolvable:$true] %s460_s30 }
  0x1f   : > { %s3600_s1 = sld [smem:[#allocation40_spill]] }
  0x20   : > { %s3597_s25 = scalar_select %p2944_p3, 1, 0 }
  0x21   : > { %p2109_p5 = pneg %p2944_p3 }
  0x22   : > { %3598 = sst [smem:[#allocation38_spill]] %s3597_s25 }
  0x23   : > { %p2955_p6 = pnand %p2109_p5, %p3580_p1 }
  0x25   : > { %s2284_s22 = scalar_lea.hbm %s3600_s1, 16  ;;  %p2969_p8 = pneg %p2955_p6 }
  0x26   : > { %p2285_p7 = scmp.ne.s32.totalorder %s3600_s1, %s2284_s22  ;;  %p2291_p11 = scmp.lt.u32.totalorder %s2284_s22, %s3600_s1 }
  0x28   : > { %p2287_p9 = pnand %p2969_p8, %p2285_p7 }
  0x2a   : > { %p2288_p10 = pneg %p2287_p9 }
  0x2c   : > { %p2293_p12 = pnand %p2291_p11, %p2288_p10 }
  0x2e   : > { %2296 = shalt.err (!%p2293_p12)
}
  0x2f   : > { %s2297_s13 = scalar_lea.vmem %s2942_s23, 16  ;;  %s2304_s15 = scalar_lea.vmem %s2942_s23, 32 }
  0x30   : > { %p2298_p13 = scmp.ne.s32.totalorder %s2942_s23, %s2297_s13  ;;  %p2305_p5 = scmp.lt.s32.totalorder %s2942_s23, %s2942_s23 }
  0x31   : > { %p2306_p7 = scmp.lt.s32.totalorder %s2304_s15, %s2297_s13 }
  0x32   : > { %p2300_p0 = pnand %p2298_p13, %p2969_p8 }
  0x33   : > { %p2307_p9 = por %p2306_p7, %p2305_p5 }
  0x34   : > { %p2301_p2 = pneg %p2300_p0 }
  0x36   : > { %p2308_p4 = pnand %p2307_p9, %p2301_p2 }
  0x38   : > { %2311 = shalt.err (!%p2308_p4)
}
  0x39   : > { %2112 = dma.hbm_to_vmem [thread:$0]  (!%p2955_p6), %s3600_s1, 16, %s2942_s23, [#allocation7]  }
  0x3a   : > { %s3602_s3 = sld [smem:[#allocation42_spill]] }
  0x40   : > { %s2312_s29 = scalar_lea.hbm %s3602_s3, 256 }
  0x41   : > { %p2313_p10 = scmp.ne.s32.totalorder %s3602_s3, %s2312_s29  ;;  %p2319_p4 = scmp.lt.u32.totalorder %s2312_s29, %s3602_s3 }
  0x43   : > { %p2315_p11 = pnand %p2313_p10, %p2969_p8 }
  0x45   : > { %p2316_p12 = pneg %p2315_p11 }
  0x47   : > { %p2321_p13 = pnand %p2319_p4, %p2316_p12 }
  0x49   : > { %2324 = shalt.err (!%p2321_p13)
}
  0x4a   : > { %s2325_s23 = scalar_lea.vmem %s2951_s27, 256  ;;  %p2333_p7 = scmp.lt.s32.totalorder %s2951_s27, %s2951_s27 }
  0x4b   : > { %p2326_p0 = scmp.ne.s32.totalorder %s2951_s27, %s2325_s23  ;;  %p2334_p9 = scmp.lt.s32.totalorder %s2325_s23, %s2325_s23 }
  0x4d   : > { %p2328_p2 = pnand %p2326_p0, %p2969_p8  ;;  %p2335_p10 = por %p2334_p9, %p2333_p7 }
  0x4f   : > { %p2329_p5 = pneg %p2328_p2 }
  0x51   : > { %p2336_p11 = pnand %p2335_p10, %p2329_p5 }
  0x53   : > { %2339 = shalt.err (!%p2336_p11)
}
  0x54   : > { %s2805_s0 = smov 64   ;;  %s2806_s25 = smov 4  }
  0x55   : > { %2118 = dma.hbm_to_vmem [thread:$0]  (!%p2955_p6), %s3602_s3, 256, %s2951_s27, [#allocation10], %s2805_s0, %s2805_s0, %s2806_s25  }
  0x56   : > { %s3603_s5 = sld [smem:[#allocation44_spill]] }
  0x5c   : > { %s2340_s29 = scalar_lea.hbm %s3603_s5, 256 }
  0x5d   : > { %p2341_p12 = scmp.ne.s32.totalorder %s3603_s5, %s2340_s29  ;;  %p2347_p0 = scmp.lt.u32.totalorder %s2340_s29, %s3603_s5 }
  0x5f   : > { %p2343_p4 = pnand %p2341_p12, %p2969_p8 }
  0x61   : > { %p2344_p13 = pneg %p2343_p4 }
  0x63   : > { %p2349_p2 = pnand %p2347_p0, %p2344_p13 }
  0x65   : > { %2352 = shalt.err (!%p2349_p2)
}
  0x66   : > { %s2353_s27 = scalar_lea.vmem %s2959_s30, 256  ;;  %p2361_p10 = scmp.lt.s32.totalorder %s2959_s30, %s2959_s30 }
  0x67   : > { %p2354_p5 = scmp.ne.s32.totalorder %s2959_s30, %s2353_s27  ;;  %p2362_p11 = scmp.lt.s32.totalorder %s2353_s27, %s2353_s27 }
  0x69   : > { %p2356_p7 = pnand %p2354_p5, %p2969_p8  ;;  %p2363_p12 = por %p2362_p11, %p2361_p10 }
  0x6b   : > { %p2357_p9 = pneg %p2356_p7 }
  0x6d   : > { %p2364_p4 = pnand %p2363_p12, %p2357_p9 }
  0x6f   : > { %2367 = shalt.err (!%p2364_p4)
}
  0x70   : > { %2124 = dma.hbm_to_vmem [thread:$0]  (!%p2955_p6), %s3603_s5, 256, %s2959_s30, [#allocation13], %s2805_s0, %s2805_s0, %s2806_s25  }
  0x71   : > { %s2807_s16 = smov [#allocation15]   ;;  %s2808_s22 = smov [#allocation18]  }
  0x72   : > { %s485_s17 = sshll.u32 %s2807_s16, 4  ;;  %s506_s29 = sshll.u32 %s2808_s22, 4  ;;  %s486_s17 = int_to_ptr.vmem [resolvable:$true] %s485_s17  ;;  %s507_s29 = int_to_ptr.vmem [resolvable:$true] %s506_s29 }
  0x73   : > { %s3604_s7 = sld [smem:[#allocation46_spill]] }
  0x79   : > { %s2368_s23 = scalar_lea.hbm %s3604_s7, 16 }
  0x7a   : > { %p2369_p13 = scmp.ne.s32.totalorder %s3604_s7, %s2368_s23  ;;  %p2375_p5 = scmp.lt.u32.totalorder %s2368_s23, %s3604_s7 }
  0x7c   : > { %p2371_p0 = pnand %p2369_p13, %p2969_p8 }
  0x7e   : > { %p2372_p2 = pneg %p2371_p0 }
  0x80   : > { %p2377_p7 = pnand %p2375_p5, %p2372_p2 }
  0x82   : > { %2380 = shalt.err (!%p2377_p7)
}
  0x83   : > { %s2381_s30 = scalar_lea.vmem %s486_s17, 16  ;;  %s2388_s14 = scalar_lea.vmem %s486_s17, 32 }
  0x84   : > { %p2382_p9 = scmp.ne.s32.totalorder %s486_s17, %s2381_s30  ;;  %p2389_p12 = scmp.lt.s32.totalorder %s486_s17, %s486_s17 }
  0x85   : > { %p2390_p4 = scmp.lt.s32.totalorder %s2388_s14, %s2381_s30 }
  0x86   : > { %p2384_p10 = pnand %p2382_p9, %p2969_p8 }
  0x87   : > { %p2391_p1 = por %p2390_p4, %p2389_p12 }
  0x88   : > { %p2385_p11 = pneg %p2384_p10 }
  0x8a   : > { %p2392_p3 = pnand %p2391_p1, %p2385_p11 }
  0x8c   : > { %2395 = shalt.err (!%p2392_p3)
}
  0x8d   : > { %2130 = dma.hbm_to_vmem [thread:$0]  (!%p2955_p6), %s3604_s7, 16, %s486_s17, [#allocation16]  }
  0x8e   : > { %s2396_s13 = scalar_lea.hbm %s3565_s9, 256 }
  0x8f   : > { %p2397_p13 = scmp.ne.s32.totalorder %s3565_s9, %s2396_s13  ;;  %p2403_p3 = scmp.lt.u32.totalorder %s2396_s13, %s3565_s9 }
  0x91   : > { %p2399_p0 = pnand %p2397_p13, %p2969_p8 }
  0x93   : > { %p2400_p1 = pneg %p2399_p0 }
  0x95   : > { %p2405_p2 = pnand %p2403_p3, %p2400_p1 }
  0x97   : > { %2408 = shalt.err (!%p2405_p2)
}
  0x98   : > { %s2409_s30 = scalar_lea.vmem %s507_s29, 256  ;;  %p2417_p10 = scmp.lt.s32.totalorder %s507_s29, %s507_s29 }
  0x99   : > { %p2410_p5 = scmp.ne.s32.totalorder %s507_s29, %s2409_s30  ;;  %p2418_p11 = scmp.lt.s32.totalorder %s2409_s30, %s2409_s30 }
  0x9b   : > { %p2412_p7 = pnand %p2410_p5, %p2969_p8  ;;  %p2419_p12 = por %p2418_p11, %p2417_p10 }
  0x9d   : > { %p2413_p9 = pneg %p2412_p7 }
  0x9f   : > { %p2420_p4 = pnand %p2419_p12, %p2413_p9 }
  0xa1   : > { %2423 = shalt.err (!%p2420_p4)
}
  0xa2   : > { %2136 = dma.hbm_to_vmem [thread:$0]  (!%p2955_p6), %s3565_s9, 256, %s507_s29, [#allocation19], %s2805_s0, %s2805_s0, %s2806_s25  }
  0xa3   : > { %s2809_s3 = smov [#allocation21]   ;;  %s2810_s24 = smov [#allocation8]  }
  0xa4   : > { %s530_s16 = sshll.u32 %s2809_s3, 4  ;;  %s426_s22 = sshll.u32 %s2810_s24, 4  ;;  %s531_s16 = int_to_ptr.vmem [resolvable:$true] %s530_s16  ;;  %s427_s22 = int_to_ptr.vmem [resolvable:$true] %s426_s22 }
  0xa5   : > { %s2424_s23 = scalar_lea.hbm %s3567_s11, 1024 }
  0xa6   : > { %p2425_p13 = scmp.ne.s32.totalorder %s3567_s11, %s2424_s23  ;;  %p2431_p3 = scmp.lt.u32.totalorder %s2424_s23, %s3567_s11 }
  0xa8   : > { %p2427_p0 = pnand %p2425_p13, %p2969_p8 }
  0xaa   : > { %p2428_p1 = pneg %p2427_p0 }
  0xac   : > { %p2433_p2 = pnand %p2431_p3, %p2428_p1 }
  0xae   : > { %2436 = shalt.err (!%p2433_p2)
}
  0xaf   : > { %s2437_s29 = scalar_lea.vmem %s531_s16, 1024  ;;  %p2445_p10 = scmp.lt.s32.totalorder %s531_s16, %s531_s16 }
  0xb0   : > { %p2438_p5 = scmp.ne.s32.totalorder %s531_s16, %s2437_s29  ;;  %p2446_p11 = scmp.lt.s32.totalorder %s2437_s29, %s2437_s29 }
  0xb2   : > { %p2440_p7 = pnand %p2438_p5, %p2969_p8  ;;  %p2447_p12 = por %p2446_p11, %p2445_p10 }
  0xb4   : > { %p2441_p9 = pneg %p2440_p7 }
  0xb6   : > { %p2448_p4 = pnand %p2447_p12, %p2441_p9 }
  0xb8   : > { %2451 = shalt.err (!%p2448_p4)
}
  0xb9   : > { %2142 = dma.hbm_to_vmem [thread:$0]  (!%p2955_p6), %s3567_s11, 1024, %s531_s16, [#allocation22], %s2805_s0, %s2805_s0, %s2806_s25  }
  0xba   : > { %s3605_s2 = sld [smem:[#allocation41_spill]] }
  0xc0   : > { %s2452_s15 = scalar_lea.hbm %s3605_s2, 16 }
  0xc1   : > { %p2453_p13 = scmp.ne.s32.totalorder %s3605_s2, %s2452_s15  ;;  %p2459_p3 = scmp.lt.u32.totalorder %s2452_s15, %s3605_s2 }
  0xc3   : > { %p2455_p0 = pnand %p2453_p13, %p2969_p8 }
  0xc5   : > { %p2456_p1 = pneg %p2455_p0 }
  0xc7   : > { %p2461_p2 = pnand %p2459_p3, %p2456_p1 }
  0xc9   : > { %2464 = shalt.err (!%p2461_p2)
}
  0xca   : > { %s2465_s17 = scalar_lea.vmem %s427_s22, 16  ;;  %s2472_s0 = scalar_lea.vmem %s427_s22, 32 }
  0xcb   : > { %p2466_p5 = scmp.ne.s32.totalorder %s427_s22, %s2465_s17  ;;  %p2473_p10 = scmp.lt.s32.totalorder %s427_s22, %s427_s22 }
  0xcc   : > { %p2474_p11 = scmp.lt.s32.totalorder %s2472_s0, %s2465_s17 }
  0xcd   : > { %p2468_p7 = pnand %p2466_p5, %p2969_p8 }
  0xce   : > { %p2475_p12 = por %p2474_p11, %p2473_p10 }
  0xcf   : > { %p2469_p9 = pneg %p2468_p7 }
  0xd1   : > { %p2476_p4 = pnand %p2475_p12, %p2469_p9 }
  0xd3   : > { %2479 = shalt.err (!%p2476_p4)
}
  0xd4   : > { %2115 = dma.hbm_to_vmem [thread:$0]  (!%p2955_p6), %s3605_s2, 16, %s427_s22, [#allocation7]  }
  0xd5   : > { %s2811_s29 = smov [#allocation11]   ;;  %s2812_s3 = smov [#allocation14]  }
  0xd6   : > { %s450_s14 = sshll.u32 %s2811_s29, 4  ;;  %s474_s24 = sshll.u32 %s2812_s3, 4  ;;  %s451_s14 = int_to_ptr.vmem [resolvable:$true] %s450_s14  ;;  %s475_s24 = int_to_ptr.vmem [resolvable:$true] %s474_s24 }
  0xd7   : > { %s3606_s4 = sld [smem:[#allocation43_spill]] }
  0xdd   : > { %s2480_s23 = scalar_lea.hbm %s3606_s4, 16 }
  0xde   : > { %p2481_p13 = scmp.ne.s32.totalorder %s3606_s4, %s2480_s23  ;;  %p2487_p3 = scmp.lt.u32.totalorder %s2480_s23, %s3606_s4 }
  0xe0   : > { %p2483_p0 = pnand %p2481_p13, %p2969_p8 }
  0xe2   : > { %p2484_p1 = pneg %p2483_p0 }
  0xe4   : > { %p2489_p2 = pnand %p2487_p3, %p2484_p1 }
  0xe6   : > { %2492 = shalt.err (!%p2489_p2)
}
  0xe7   : > { %s2493_s22 = scalar_lea.vmem %s451_s14, 16  ;;  %s2500_s0 = scalar_lea.vmem %s451_s14, 32 }
  0xe8   : > { %p2494_p5 = scmp.ne.s32.totalorder %s451_s14, %s2493_s22  ;;  %p2501_p10 = scmp.lt.s32.totalorder %s451_s14, %s451_s14 }
  0xe9   : > { %p2502_p11 = scmp.lt.s32.totalorder %s2500_s0, %s2493_s22 }
  0xea   : > { %p2496_p7 = pnand %p2494_p5, %p2969_p8 }
  0xeb   : > { %p2503_p12 = por %p2502_p11, %p2501_p10 }
  0xec   : > { %p2497_p9 = pneg %p2496_p7 }
  0xee   : > { %p2504_p4 = pnand %p2503_p12, %p2497_p9 }
  0xf0   : > { %2507 = shalt.err (!%p2504_p4)
}
  0xf1   : > { %2121 = dma.hbm_to_vmem [thread:$0]  (!%p2955_p6), %s3606_s4, 16, %s451_s14, [#allocation10]  }
  0xf2   : > { %s3607_s6 = sld [smem:[#allocation45_spill]] }
  0xf8   : > { %s2508_s13 = scalar_lea.hbm %s3607_s6, 16 }
  0xf9   : > { %p2509_p13 = scmp.ne.s32.totalorder %s3607_s6, %s2508_s13  ;;  %p2515_p3 = scmp.lt.u32.totalorder %s2508_s13, %s3607_s6 }
  0xfb   : > { %p2511_p0 = pnand %p2509_p13, %p2969_p8 }
  0xfd   : > { %p2512_p1 = pneg %p2511_p0 }
  0xff   : > { %p2517_p2 = pnand %p2515_p3, %p2512_p1 }
 0x101   : > { %2520 = shalt.err (!%p2517_p2)
}
 0x102   : > { %s2521_s30 = scalar_lea.vmem %s475_s24, 16  ;;  %s2528_s14 = scalar_lea.vmem %s475_s24, 32 }
 0x103   : > { %p2522_p5 = scmp.ne.s32.totalorder %s475_s24, %s2521_s30  ;;  %p2529_p10 = scmp.lt.s32.totalorder %s475_s24, %s475_s24 }
 0x104   : > { %p2530_p11 = scmp.lt.s32.totalorder %s2528_s14, %s2521_s30 }
 0x105   : > { %p2524_p7 = pnand %p2522_p5, %p2969_p8 }
 0x106   : > { %p2531_p12 = por %p2530_p11, %p2529_p10 }
 0x107   : > { %p2525_p9 = pneg %p2524_p7 }
 0x109   : > { %p2532_p4 = pnand %p2531_p12, %p2525_p9 }
 0x10b   : > { %2535 = shalt.err (!%p2532_p4)
}
 0x10c   : > { %2127 = dma.hbm_to_vmem [thread:$0]  (!%p2955_p6), %s3607_s6, 16, %s475_s24, [#allocation13]  }
 0x10d   : > { %s2813_s0 = smov [#allocation17]   ;;  %s2814_s16 = smov [#allocation20]  }
 0x10e   : > { %s496_s25 = sshll.u32 %s2813_s0, 4  ;;  %s520_s29 = sshll.u32 %s2814_s16, 4  ;;  %s497_s25 = int_to_ptr.vmem [resolvable:$true] %s496_s25  ;;  %s521_s29 = int_to_ptr.vmem [resolvable:$true] %s520_s29 }
 0x10f   : > { %s2536_s15 = scalar_lea.hbm %s3564_s8, 16 }
 0x110   : > { %p2537_p13 = scmp.ne.s32.totalorder %s3564_s8, %s2536_s15  ;;  %p2543_p3 = scmp.lt.u32.totalorder %s2536_s15, %s3564_s8 }
 0x112   : > { %p2539_p0 = pnand %p2537_p13, %p2969_p8 }
 0x114   : > { %p2540_p1 = pneg %p2539_p0 }
 0x116   : > { %p2545_p2 = pnand %p2543_p3, %p2540_p1 }
 0x118   : > { %2548 = shalt.err (!%p2545_p2)
}
 0x119   : > { %s2549_s24 = scalar_lea.vmem %s497_s25, 16  ;;  %s2556_s14 = scalar_lea.vmem %s497_s25, 32 }
 0x11a   : > { %p2550_p5 = scmp.ne.s32.totalorder %s497_s25, %s2549_s24  ;;  %p2557_p10 = scmp.lt.s32.totalorder %s497_s25, %s497_s25 }
 0x11b   : > { %p2558_p11 = scmp.lt.s32.totalorder %s2556_s14, %s2549_s24 }
 0x11c   : > { %p2552_p7 = pnand %p2550_p5, %p2969_p8 }
 0x11d   : > { %p2559_p12 = por %p2558_p11, %p2557_p10 }
 0x11e   : > { %p2553_p9 = pneg %p2552_p7 }
 0x120   : > { %p2560_p4 = pnand %p2559_p12, %p2553_p9 }
 0x122   : > { %2563 = shalt.err (!%p2560_p4)
}
 0x123   : > { %2133 = dma.hbm_to_vmem [thread:$0]  (!%p2955_p6), %s3564_s8, 16, %s497_s25, [#allocation16]  }
 0x124   : > { %s2564_s3 = scalar_lea.hbm %s3566_s10, 16 }
 0x125   : > { %p2565_p13 = scmp.ne.s32.totalorder %s3566_s10, %s2564_s3  ;;  %p2571_p3 = scmp.lt.u32.totalorder %s2564_s3, %s3566_s10 }
 0x127   : > { %p2567_p0 = pnand %p2565_p13, %p2969_p8 }
 0x129   : > { %p2568_p1 = pneg %p2567_p0 }
 0x12b   : > { %p2573_p2 = pnand %p2571_p3, %p2568_p1 }
 0x12d   : > { %2576 = shalt.err (!%p2573_p2)
}
 0x12e   : > { %s2577_s1 = scalar_lea.vmem %s521_s29, 16  ;;  %s2584_s25 = scalar_lea.vmem %s521_s29, 32 }
 0x12f   : > { %p2578_p5 = scmp.ne.s32.totalorder %s521_s29, %s2577_s1  ;;  %p2585_p10 = scmp.lt.s32.totalorder %s521_s29, %s521_s29 }
 0x130   : > { %p2586_p11 = scmp.lt.s32.totalorder %s2584_s25, %s2577_s1 }
 0x131   : > { %p2580_p7 = pnand %p2578_p5, %p2969_p8 }
 0x132   : > { %p2587_p12 = por %p2586_p11, %p2585_p10 }
 0x133   : > { %p2581_p9 = pneg %p2580_p7 }
 0x135   : > { %p2588_p4 = pnand %p2587_p12, %p2581_p9 }
 0x137   : > { %2591 = shalt.err (!%p2588_p4)
}
 0x138   : > { %2139 = dma.hbm_to_vmem [thread:$0]  (!%p2955_p6), %s3566_s10, 16, %s521_s29, [#allocation19]  }
 0x139   : > { %s2815_s14 = smov [#allocation23]   ;;  %s2592_s16 = scalar_lea.hbm %s3568_s12, 16 }
 0x13a   : > { %s544_s17 = sshll.u32 %s2815_s14, 4  ;;  %p2593_p13 = scmp.ne.s32.totalorder %s3568_s12, %s2592_s16  ;;  %s545_s17 = int_to_ptr.vmem [resolvable:$true] %s544_s17 }
 0x13b   : > { %p2599_p3 = scmp.lt.u32.totalorder %s2592_s16, %s3568_s12 }
 0x13c   : > { %p2595_p0 = pnand %p2593_p13, %p2969_p8 }
 0x13e   : > { %p2596_p1 = pneg %p2595_p0 }
 0x140   : > { %p2601_p2 = pnand %p2599_p3, %p2596_p1 }
 0x142   : > { %2604 = shalt.err (!%p2601_p2)
}
 0x143   : > { %s2605_s29 = scalar_lea.vmem %s545_s17, 16  ;;  %s2612_s27 = scalar_lea.vmem %s545_s17, 32 }
 0x144   : > { %p2606_p5 = scmp.ne.s32.totalorder %s545_s17, %s2605_s29  ;;  %p2613_p10 = scmp.lt.s32.totalorder %s545_s17, %s545_s17 }
 0x145   : > { %p2614_p11 = scmp.lt.s32.totalorder %s2612_s27, %s2605_s29 }
 0x146   : > { %p2608_p7 = pnand %p2606_p5, %p2969_p8 }
 0x147   : > { %p2615_p12 = por %p2614_p11, %p2613_p10 }
 0x148   : > { %p2609_p9 = pneg %p2608_p7 }
 0x14a   : > { %p2616_p4 = pnand %p2615_p12, %p2609_p9 }
 0x14c   : > { %2619 = shalt.err (!%p2616_p4)
}
 0x14d   : > { %s3608_s26 = sld [smem:[#allocation37_spill]]  ;;  %s3582_s28 = sadd.s32 4294967294, %s2800_s21  }
 0x14e   : > { %2145 = dma.hbm_to_vmem [thread:$0]  (!%p2955_p6), %s3568_s12, 16, %s545_s17, [#allocation22]  }
 0x14f   : > { %s3213_s30 = sadd.s32 1, %s2800_s21   ;;  %s48_s14 = sadd.s32 1, %s2796_s20 }
 0x150   : > { %s45_s24 = ssub.s32 %s2800_s21, %s3213_s30  ;;  %p55_p13 = scmp.ne.s32.totalorder %s2796_s20, %s2792_s19 }
 0x151   : > { %p46_p8 = scmp.eq.s32.totalorder %s45_s24, 0  ;;  %p56_p0 = scmp.eq.s32.totalorder %s2800_s21, 0 }
 0x152   : > { %p61_p1 = scmp.ne.s32.totalorder %s2792_s19, %s2788_s18  ;;  %p343_p7 = scmp.eq.s32.totalorder %s3582_s28, 1 }
 0x153   : > { %s3224_s22 = scalar_select %p46_p8, %s2796_s20, %s48_s14  }
 0x154   : > { %p3226_p3 = por %p56_p0, %p55_p13  ;;  %p3610_p2 = scmp.eq.s32.totalorder %s3608_s26, 0 }
 0x155   : > { %p337_p5 = scmp.eq.s32.totalorder %s3608_s26, 1  ;;  %p2172_p9 = scmp.lt.s32.totalorder %s2800_s21, 2 }
 0x156   : > { %p3232_p6 = por %p3610_p2, %p61_p1  ;;  %s555_s16 = sand.u32 1, %s2796_s20  }
 0x157   : > { %p3241_p10 = por %p337_p5, %p55_p13  ;;  %p3245_p11 = por %p343_p7, %p61_p1 }
 0x158   : > { %s1867_s15 = sshll.u32 %s555_s16, 3  ;;  %s1868_s23 = sshll.u32 %s2800_s21, 7 }
 0x159   : > { %s3612_s3 = scalar_select %p3241_p10, 1, 0 }
 0x15a   : > { %s3613_s13 = scalar_select %p3245_p11, 1, 0 }
 0x15b   : > { %s3614_s1 = sld [smem:[#allocation39_spill]]  ;;  %s559_s26 = scalar_lea.vmem [#allocation3], %s1867_s15 }
 0x15c   : > { %s566_s24 = sshll.u32 %s559_s26, 4  ;;  %p3259_p12 = pnand %p2172_p9, %p3226_p3  ;;  %s3255_s24 = int_to_ptr.vmem [resolvable:$true] %s566_s24 }
 0x15d   : > { %s556_s28 = scalar_lea.sflag [#allocation4], %s555_s16 }
 0x15e   : > { %p2622_p8 = pneg %p3259_p12 }
 0x161   : > { %s3253_s25 = scalar_lea.hbm %s3614_s1, %s1868_s23  ;;  %s2625_s29 = scalar_lea.hbm %s3614_s1, 256 }
 0x162   : > { %s2620_s2 = scalar_lea.hbm %s3253_s25, 128  ;;  %p2626_p1 = scmp.lt.u32.totalorder %s3253_s25, %s3614_s1 }
 0x163   : > { %p2621_p4 = scmp.ne.s32.totalorder %s3253_s25, %s2620_s2  ;;  %p2627_p3 = scmp.lt.u32.totalorder %s2625_s29, %s2620_s2 }
 0x164   : > { %p2629_p5 = scmp.lt.u32.totalorder %s2620_s2, %s3253_s25 }
 0x165   : > { %p2623_p13 = pnand %p2622_p8, %p2621_p4  ;;  %p2628_p2 = por %p2627_p3, %p2626_p1 }
 0x167   : > { %p2624_p0 = pneg %p2623_p13  ;;  %p2630_p7 = por %p2629_p5, %p2628_p2 }
 0x169   : > { %p2631_p9 = pnand %p2630_p7, %p2624_p0 }
 0x16b   : > { %2634 = shalt.err (!%p2631_p9)
}
 0x16c   : > { %s2635_s16 = scalar_lea.vmem %s3255_s24, 128  ;;  %s2816_s26 = smov [#allocation3]  }
 0x16d   : > { %p2636_p4 = scmp.ne.s32.totalorder %s3255_s24, %s2635_s16  ;;  %s2640_s15 = sshll.u32 %s2816_s26, 4  ;;  %s2641_s15 = int_to_ptr.vmem [resolvable:$false] %s2640_s15 }
 0x16e   : > { %s2642_s23 = scalar_lea.vmem %s2641_s15, 256  ;;  %p2643_p10 = scmp.lt.s32.totalorder %s3255_s24, %s2641_s15 }
 0x16f   : > { %p2638_p13 = pnand %p2636_p4, %p2622_p8  ;;  %p2644_p1 = scmp.lt.s32.totalorder %s2642_s23, %s2635_s16 }
 0x171   : > { %p2639_p11 = pneg %p2638_p13  ;;  %p2645_p3 = por %p2644_p1, %p2643_p10 }
 0x173   : > { %p2646_p2 = pnand %p2645_p3, %p2639_p11 }
 0x175   : > { %2649 = shalt.err (!%p2646_p2)
}
 0x176   : > { %2149 = dma.hbm_to_vmem [thread:$0]  (!%p3259_p12), %s3253_s25, 128, %s3255_s24, %s556_s28  }
 0x177   : > { %s3616_s2 = sld [smem:[#allocation38_spill]] }
 0x17d   : > { %p3617_p0 = scmp.ne.s32.totalorder %s3616_s2, 0 }
 0x17e   : > { %s3291_s29 = sand.u32 (!%p3617_p0), 1, %s2792_s19  }
 0x17f   : > { %575 = sbr.rel (%p3617_p0) target bundleno = 3002 (0xbba), region = 72  ;;  %s3294_s0 = sshll.u32 (!%p3617_p0), %s3291_s29, 3 }
 0x180   : > { %s578_s27 = scalar_lea.sflag (!%p3617_p0), [#allocation4], %s3291_s29  ;;  %s581_s16 = scalar_lea.vmem (!%p3617_p0), [#allocation3], %s3294_s0 }
 0x186   : > { %2751 = dma.done.wait (%p3232_p6), %s578_s27, 128  }
 0x187   : > { %2753 = vsyncadd (%p3232_p6), %s578_s27, 4294967168  ;;  %s3618_s28 = sld [smem:[#allocation37_spill]] }
 0x18d   : > { %p3619_p10 = scmp.eq.s32.totalorder %s3618_s28, 0 }
 0x18f   : > { %2755 = dma.done.wait (%p3619_p10), [#allocation7], 32   ;;  %p3620_p11 = pmov %p3619_p10 }
 0x190   : > { %p3621_p12 = pmov %p3619_p10 }
 0x191   : > { %2757 = vsyncadd (%p3620_p11), [#allocation7], 4294967264 }
 0x192   : > { %2759 = dma.done.wait (%p3621_p12), [#allocation10], 272   ;;  %p3622_p8 = pmov %p3619_p10 }
 0x194   : > { %2761 = vsyncadd (%p3622_p8), [#allocation10], 4294967024  ;;  %p3623_p5 = pmov %p3622_p8 }
 0x196   : > { %2763 = dma.done.wait (%p3623_p5), [#allocation13], 272   ;;  %p3624_p7 = pmov %p3623_p5 }
 0x197   : > { %p3625_p6 = pmov %p3623_p5 }
 0x198   : > { %2765 = vsyncadd (%p3624_p7), [#allocation13], 4294967024 }
 0x199   : > { %2767 = dma.done.wait (%p3625_p6), [#allocation16], 32   ;;  %p3626_p9 = pmov %p3623_p5 }
 0x19a   : > { %p3627_p4 = pmov %p3623_p5 }
 0x19b   : > { %2769 = vsyncadd (%p3626_p9), [#allocation16], 4294967264 }
 0x19c   : > { %2771 = dma.done.wait (%p3627_p4), [#allocation19], 272   ;;  %p3628_p13 = pmov %p3627_p4 }
 0x19d   : > { %p3629_p1 = pmov %p3627_p4 }
 0x19e   : > { %2773 = vsyncadd (%p3628_p13), [#allocation19], 4294967024 }
 0x19f   : > { %2775 = dma.done.wait (%p3629_p1), [#allocation22], 1040   ;;  %p3630_p3 = pmov %p3629_p1 }
 0x1a0   : > { %vm690_vm0 = vcmask 261120   ;;  %v3326_v0 = vld [vmem:[%s581_s16] sm:$0xff]  ;;  %v2248_v7 = vld [vmem:[#allocation9] sm:$0xff]   ;;  %v2817_v8 = vmov 0.0   ;;  %vm2818_vm1 = vmmov 0   ;;  %s2819_s17 = smov 120   ;;  %v795_v38 = vlaneseq }
 0x1a1   : > { %2777 = vsyncadd (%p3630_p3), [#allocation22], 4294966256  ;;  %v691_v1 = vsel %vm690_vm0, %v3326_v0, 0.0  ;;  %1961 = vmatprep.subr.bf16.mxu0 %v2817_v8  ;;  %1965 = vmatprep.mubr.msk.bf16.mxu0 %vm2818_vm1, %v2817_v8  ;;  %v2249_v9 = vld [vmem:[#allocation9 + $0x8] sm:$0xff]   ;;  %v1886_v14 = vld [vmem:[#allocation6] ss:$0 sm:$0xff] }
 0x1a2   : > { %692 = vadd.xlane.f32.xlu0 %v691_v1  ;;  %1962 = vmatpush3.bf16.msra.mxu0 %v2248_v7  ;;  %v1887_v16 = vld [vmem:[#allocation8] ss:$0 sm:$0xff]  ;;  %v1888_v20 = vld [vmem:[#allocation11] ss:$0 sm:$0xff]  ;;  %s2820_s25 = smov 96   ;;  %s2821_s24 = smov 88  }
 0x1a3   : > { %1981 = vmatprep.subr.bf16.mxu1 %v2817_v8  ;;  %1963 = vmatprep.subr.bf16.mxu0 %v2817_v8  ;;  %s2822_s14 = smov 80   ;;  %s2823_s26 = smov 112   ;;  %vm804_vm2 = vcmask 64512   ;;  %v796_v39 = vshrl.u32 %v795_v38, 7  ;;  %v798_v40 = vand.u32 127, %v795_v38  ;;  %vm870_vm4 = vcmask 1043456  }
 0x1a4   : > { %1983 = vmatprep.mubr.msk.bf16.mxu1 %vm2818_vm1, %v2817_v8  ;;  %s2824_s15 = smov 72   ;;  %s2825_s23 = smov 104   ;;  %vm1031_vm5 = vcmask 130112   ;;  %vm1149_vm6 = vcmask 195712   ;;  %vm1267_vm7 = vcmask 261312  }
 0x1a5   : > { %vm799_vm3 = vcmp.le.s32.totalorder %v798_v40, %v796_v39  ;;  %s2826_s2 = smov 64   ;;  %s2827_s27 = smov 56  }
 0x1a6   : > { %1964 = vmatpush3.bf16.msra.mxu0 %v2249_v9  ;;  %s2828_s16 = smov 48   ;;  %p3632_p0 = scmp.ne.s32.totalorder %s3612_s3, 0 }
 0x1a7   : > { %1969 = vmatprep.subr.bf16.mxu0 %v2817_v8 }
 0x22f   : > { %v693_v2 = vpop.xlane.xlu0 %692 }
 0x230   : > { %v695_v3 = vmul.f32 0.03125, %v693_v2 }
 0x232   : > { %v696_v4 = vsub.f32 %v3326_v0, %v695_v3 }
 0x234   : > { %v697_v5 = vmul.f32 %v696_v4, %v696_v4 }
 0x236   : > { %v698_v6 = vsel %vm690_vm0, %v697_v5, 0.0 }
 0x237   : > { %699 = vadd.xlane.f32.xlu0 %v698_v6 }
 0x2c4   : > { %v700_v10 = vpop.xlane.xlu0 %699 }
 0x2c5   : > { %v701_v11 = vmul.f32 0.03125, %v700_v10 }
 0x2c7   : > { %v702_v12 = vadd.f32 1e-05, %v701_v11 }
 0x2c9   : > { %2262 = vrsqrt.f32 %v702_v12 }
 0x2d3   : > { %v2263_v13 = vpop.eup %2262 }
 0x2d4   : > { %v704_v15 = vmul.f32 %v2263_v13, %v696_v4 }
 0x2d6   : > { %v711_v17 = vmul.f32 %v1886_v14, %v704_v15 }
 0x2d8   : > { %v718_v18 = vadd.f32 %v1887_v16, %v711_v17 }
 0x2da   : > { %v719_v19 = vpack.c.bf16 %v718_v18, %v718_v18 }
 0x2dc   : > { %1966 = vmatmul.mubr.msk.bf16.vlgmr.msra.gmra.mrb[0].mxu0 %vm690_vm0, %v719_v19 }
 0x2dd   : > { %1971 = vmatprep.mubr.msk.bf16.mxu0 %vm2818_vm1, %v2817_v8 }
 0x3af   : > { %v780_v21 = vpop.f32.mrb[0].mxu0 }
 0x3b0   : > { %v3343_v22 = vadd.f32 %v1888_v20, %v780_v21  ;;  %v1967_v23 = vpop.f32.mrb[1].mxu0 }
 0x3b1   : > { %v783_v24 = vpop.f32.mrb[2].mxu0 }
 0x3b2   : > { %v3347_v25 = vpack.c.bf16 %v3343_v22, %v3343_v22  ;;  %v1968_v26 = vpop.f32.mrb[3].mxu0 }
 0x3b4   : > { %915 = vrot.lane.b32.xlu0 %v3347_v25, %s2819_s17  ;;  %802 = vrot.lane.b32.xlu1 %v3347_v25, %s2820_s25  ;;  %s2829_s17 = smov 40  }
 0x3b8   : > { %917 = vrot.lane.b32.xlu1 %v3347_v25, %s2821_s24  ;;  %s2830_s24 = smov 8  }
 0x3bc   : > { %1035 = vrot.lane.b32.xlu1 %v3347_v25, %s2822_s14  ;;  %s2831_s14 = smov 16  }
 0x3c0   : > { %1033 = vrot.lane.b32.xlu1 %v3347_v25, %s2823_s26  ;;  %s2832_s26 = smov 24  }
 0x3c4   : > { %1153 = vrot.lane.b32.xlu1 %v3347_v25, %s2824_s15  ;;  %s685_s15 = scalar_lea.vmem [#allocation27], %s3294_s0 }
 0x3c8   : > { %1151 = vrot.lane.b32.xlu1 %v3347_v25, %s2825_s23  ;;  %s678_s23 = scalar_lea.vmem [#allocation25], %s3294_s0 }
 0x426   : > { %v803_v27 = vpop.permute.xlu1 %802  ;;  %v916_v32 = vpop.permute.xlu0 %915 }
 0x427   : > { %v809_v28 = vsel %vm804_vm2, %v803_v27, 0 }
 0x428   : > { %1970 = vmatpush3.bf16.xpose.msra.mxu0 %v809_v28 }
 0x429   : > { %1975 = vmatprep.subr.bf16.mxu0 %v2817_v8 }
 0x42a   : > { %v918_v29 = vpop.permute.xlu1 %917 }
 0x42b   : > { %v923_v30 = vsel %vm804_vm2, %v918_v29, 0 }
 0x42c   : > { %1982 = vmatpush3.bf16.xpose.msra.mxu1 %v923_v30 }
 0x42d   : > { %1993 = vmatprep.subr.bf16.mxu1 %v2817_v8 }
 0x42e   : > { %v1036_v31 = vpop.permute.xlu1 %1035 }
 0x42f   : > { %1972 = vmatmul.mubr.msk.bf16.vlgmr.msra.gmra.mrb[4].mxu0 %vm804_vm2, %v3347_v25  ;;  %v1041_v34 = vsel %vm804_vm2, %v1036_v31, 0 }
 0x430   : > { %1977 = vmatprep.mubr.msk.bf16.mxu0 %vm2818_vm1, %v2817_v8 }
 0x432   : > { %v1034_v33 = vpop.permute.xlu1 %1033 }
 0x433   : > { %1984 = vmatmul.mubr.msk.bf16.vlgmr.msra.gmra.mrb[0].mxu1 %vm804_vm2, %v916_v32 }
 0x434   : > { %1994 = vmatpush3.bf16.xpose.msra.mxu1 %v1041_v34  ;;  %1995 = vmatprep.mubr.msk.bf16.mxu1 %vm2818_vm1, %v2817_v8 }
 0x435   : > { %2005 = vmatprep.subr.bf16.mxu1 %v2817_v8 }
 0x436   : > { %v1154_v35 = vpop.permute.xlu1 %1153 }
 0x437   : > { %v1159_v36 = vsel %vm804_vm2, %v1154_v35, 0 }
 0x43a   : > { %v1152_v37 = vpop.permute.xlu1 %1151 }
 0x43b   : > { %1996 = vmatmul.mubr.msk.bf16.vlgmr.msra.gmra.mrb[4].mxu1 %vm804_vm2, %v1034_v33 }
 0x43c   : > { %2006 = vmatpush3.bf16.xpose.msra.mxu1 %v1159_v36  ;;  %2007 = vmatprep.mubr.msk.bf16.mxu1 %vm2818_vm1, %v2817_v8 }
 0x43d   : > { %2017 = vmatprep.subr.bf16.mxu1 %v2817_v8 }
 0x443   : > { %2008 = vmatmul.mubr.msk.bf16.vlgmr.msra.gmra.mrb[8].mxu1 %vm804_vm2, %v1152_v37 }
 0x444   : > { %2021 = vmatprep.mubr.msk.bf16.mxu1 %vm2818_vm1, %v2817_v8 }
 0x502   : > { %v845_v41 = vpop.f32.mrb[4].mxu0 }
 0x503   : > { %v851_v42 = vmul.f32 0.35355338, %v845_v41  ;;  %v1973_v43 = vpop.f32.mrb[5].mxu0 }
 0x504   : > { %v848_v44 = vpop.f32.mrb[6].mxu0 }
 0x505   : > { %v1974_v45 = vpop.f32.mrb[7].mxu0  ;;  %v852_v46 = vsel %vm799_vm3, %v851_v42, -10000.0 }
 0x506   : > { %v959_v47 = vpop.f32.mrb[0].mxu1  ;;  %v853_v48 = vsel %vm804_vm2, %v852_v46, -inf }
 0x507   : > { %v965_v49 = vmul.f32 0.35355338, %v959_v47  ;;  %v1985_v50 = vpop.f32.mrb[1].mxu1  ;;  %854 = vmax.xlane.f32.xlu1 %v853_v48 }
 0x508   : > { %v962_v51 = vpop.f32.mrb[2].mxu1 }
 0x509   : > { %v1986_v52 = vpop.f32.mrb[3].mxu1  ;;  %v966_v53 = vsel %vm799_vm3, %v965_v49, -10000.0 }
 0x50a   : > { %v967_v54 = vsel %vm804_vm2, %v966_v53, -inf }
 0x50b   : > { %968 = vmax.xlane.f32.xlu0 %v967_v54 }
 0x50e   : > { %v1077_v55 = vpop.f32.mrb[4].mxu1 }
 0x50f   : > { %v1083_v56 = vmul.f32 0.35355338, %v1077_v55  ;;  %v1997_v57 = vpop.f32.mrb[5].mxu1 }
 0x510   : > { %v1080_v58 = vpop.f32.mrb[6].mxu1 }
 0x511   : > { %v1998_v59 = vpop.f32.mrb[7].mxu1  ;;  %v1084_v60 = vsel %vm799_vm3, %v1083_v56, -10000.0 }
 0x512   : > { %v1085_v61 = vsel %vm804_vm2, %v1084_v60, -inf }
 0x513   : > { %1086 = vmax.xlane.f32.xlu1 %v1085_v61  ;;  %v2251_v61 = vld [vmem:[#allocation12 + $0x8] sm:$0xff]  }
 0x516   : > { %v1195_v62 = vpop.f32.mrb[8].mxu1 }
 0x517   : > { %v1201_v63 = vmul.f32 0.35355338, %v1195_v62  ;;  %v2009_v1 = vpop.f32.mrb[9].mxu1 }
 0x518   : > { %v1198_v2 = vpop.f32.mrb[10].mxu1 }
 0x519   : > { %v2010_v3 = vpop.f32.mrb[11].mxu1  ;;  %v1202_v4 = vsel %vm799_vm3, %v1201_v63, -10000.0 }
 0x51a   : > { %v1203_v5 = vsel %vm804_vm2, %v1202_v4, -inf }
 0x51b   : > { %1204 = vmax.xlane.f32.xlu0 %v1203_v5 }
 0x594   : > { %v855_v6 = vpop.xlane.xlu1 %854 }
 0x595   : > { %v856_v7 = vsub.f32 %v852_v46, %v855_v6 }
 0x597   : > { %v857_v9 = vmul.f32 1.442695, %v856_v7 }
 0x598   : > { %v969_v10 = vpop.xlane.xlu0 %968 }
 0x599   : > { %2264 = vpow2.f32 %v857_v9  ;;  %v970_v11 = vsub.f32 %v966_v53, %v969_v10 }
 0x59b   : > { %v971_v12 = vmul.f32 1.442695, %v970_v11 }
 0x59d   : > { %2266 = vpow2.f32 %v971_v12 }
 0x5a0   : > { %v1087_v23 = vpop.xlane.xlu1 %1086 }
 0x5a1   : > { %v1088_v24 = vsub.f32 %v1084_v60, %v1087_v23  ;;  %v2250_v60 = vld [vmem:[#allocation12] sm:$0xff]  }
 0x5a2   : > { %2018 = vmatpush3.bf16.msra.mxu1 %v2250_v60 }
 0x5a3   : > { %v2265_v13 = vpop.eup %2264  ;;  %v1089_v26 = vmul.f32 1.442695, %v1088_v24  ;;  %2019 = vmatprep.subr.bf16.mxu1 %v2817_v8 }
 0x5a4   : > { %v859_v14 = vsel %vm804_vm2, %v2265_v13, 0.0 }
 0x5a5   : > { %860 = vadd.xlane.f32.xlu1 %v859_v14 }
 0x5a6   : > { %2020 = vmatpush3.bf16.msra.mxu1 %v2251_v61 }
 0x5a7   : > { %v2267_v15 = vpop.eup %2266  ;;  %2033 = vmatprep.subr.bf16.mxu1 %v2817_v8 }
 0x5a8   : > { %v1205_v16 = vpop.xlane.xlu0 %1204  ;;  %v973_v17 = vsel %vm804_vm2, %v2267_v15, 0.0 }
 0x5a9   : > { %v1206_v18 = vsub.f32 %v1202_v4, %v1205_v16  ;;  %974 = vadd.xlane.f32.xlu0 %v973_v17 }
 0x5ab   : > { %v1207_v19 = vmul.f32 1.442695, %v1206_v18 }
 0x5ad   : > { %2268 = vpow2.f32 %v1207_v19 }
 0x5ae   : > { %2270 = vpow2.f32 %v1089_v26 }
 0x5b6   : > { %865 = vrot.lane.b32.xlu1 %v3347_v25, %s2826_s2 }
 0x5b7   : > { %v2269_v20 = vpop.eup %2268 }
 0x5b8   : > { %v1209_v21 = vsel %vm804_vm2, %v2269_v20, 0.0  ;;  %v2271_v27 = vpop.eup %2270 }
 0x5b9   : > { %1210 = vadd.xlane.f32.xlu0 %v1209_v21  ;;  %v1091_v28 = vsel %vm804_vm2, %v2271_v27, 0.0 }
 0x5cf   : > { %979 = vrot.lane.b32.xlu0 %v3347_v25, %s2827_s27 }
 0x5da   : > { %1092 = vadd.xlane.f32.xlu1 %v1091_v28  ;;  %v2252_v28 = vld [vmem:[#allocation18] sm:$0xff]  }
 0x5eb   : > { %1097 = vrot.lane.b32.xlu1 %v3347_v25, %s2828_s16 }
 0x5ef   : > { %1215 = vrot.lane.b32.xlu1 %v3347_v25, %s2829_s17  ;;  %s3631_s17 = sld [smem:[#allocation48_spill]] }
 0x632   : > { %v861_v29 = vpop.xlane.xlu1 %860 }
 0x633   : > { %2272 = vrcp.f32 %v861_v29  ;;  %v2253_v29 = vld [vmem:[#allocation18 + $0x8] sm:$0xff]  }
 0x636   : > { %v866_v30 = vpop.permute.xlu1 %865  ;;  %v975_v32 = vpop.xlane.xlu0 %974 }
 0x637   : > { %v872_v31 = vsel %vm870_vm4, %v866_v30, 0  ;;  %2274 = vrcp.f32 %v975_v32  ;;  %v2254_v30 = vld [vmem:[#allocation21] sm:$0xff]  }
 0x638   : > { %1976 = vmatpush3.bf16.msra.mxu0 %v872_v31 }
 0x639   : > { %1987 = vmatprep.subr.bf16.mxu0 %v2817_v8 }
 0x63d   : > { %v2273_v33 = vpop.eup %2272 }
 0x63e   : > { %v863_v34 = vmul.f32 %v2273_v33, %v2265_v13  ;;  %v1900_v13 = vld [vmem:[#allocation14] ss:$0 sm:$0xff] }
 0x640   : > { %v864_v35 = vpack.c.bf16 %v863_v34, %v863_v34 }
 0x641   : > { %v2275_v25 = vpop.eup %2274 }
 0x642   : > { %1978 = vmatmul.mubr.msk.bf16.vlgmr.msra.gmra.mrb[8].mxu0 %vm804_vm2, %v864_v35  ;;  %v977_v37 = vmul.f32 %v2275_v25, %v2267_v15  ;;  %v1904_v35 = vld [vmem:[#allocation15] ss:$0 sm:$0xff] }
 0x643   : > { %1989 = vmatprep.mubr.msk.bf16.mxu0 %vm2818_vm1, %v2817_v8 }
 0x644   : > { %v978_v40 = vpack.c.bf16 %v977_v37, %v977_v37 }
 0x646   : > { %v1211_v36 = vpop.xlane.xlu0 %1210 }
 0x64a   : > { %v980_v38 = vpop.permute.xlu0 %979 }
 0x64b   : > { %v985_v39 = vsel %vm870_vm4, %v980_v38, 0 }
 0x64c   : > { %1988 = vmatpush3.bf16.msra.mxu0 %v985_v39 }
 0x64d   : > { %1999 = vmatprep.subr.bf16.mxu0 %v2817_v8 }
 0x64f   : > { %1990 = vmatmul.mubr.msk.bf16.vlgmr.msra.gmra.mrb[12].mxu0 %vm804_vm2, %v978_v40  ;;  %v2255_v40 = vld [vmem:[#allocation21 + $0x8] sm:$0xff]  }
 0x650   : > { %2001 = vmatprep.mubr.msk.bf16.mxu0 %vm2818_vm1, %v2817_v8 }
 0x667   : > { %v1093_v41 = vpop.xlane.xlu1 %1092 }
 0x668   : > { %2276 = vrcp.f32 %v1093_v41  ;;  %v2256_v41 = vld [vmem:[#allocation21 + $0x10] sm:$0xff]  }
 0x669   : > { %2278 = vrcp.f32 %v1211_v36  ;;  %v1905_v36 = vld [vmem:[#allocation17] ss:$0 sm:$0xff] }
 0x66b   : > { %v1098_v42 = vpop.permute.xlu1 %1097 }
 0x66c   : > { %v1103_v43 = vsel %vm870_vm4, %v1098_v42, 0  ;;  %v2257_v42 = vld [vmem:[#allocation21 + $0x18] sm:$0xff]  }
 0x66d   : > { %2000 = vmatpush3.bf16.msra.mxu0 %v1103_v43  ;;  %v2258_v43 = vld [vmem:[#allocation21 + $0x20] sm:$0xff]  }
 0x66e   : > { %2011 = vmatprep.subr.bf16.mxu0 %v2817_v8 }
 0x66f   : > { %v1216_v46 = vpop.permute.xlu1 %1215 }
 0x670   : > { %v1221_v49 = vsel %vm870_vm4, %v1216_v46, 0  ;;  %v2261_v46 = vld [vmem:[#allocation21 + $0x38] sm:$0xff]  }
 0x672   : > { %v2277_v44 = vpop.eup %2276 }
 0x673   : > { %v1095_v45 = vmul.f32 %v2277_v44, %v2271_v27  ;;  %v2279_v48 = vpop.eup %2278  ;;  %v2259_v44 = vld [vmem:[#allocation21 + $0x28] sm:$0xff]  }
 0x674   : > { %v1213_v50 = vmul.f32 %v2279_v48, %v2269_v20 }
 0x675   : > { %v1096_v47 = vpack.c.bf16 %v1095_v45, %v1095_v45  ;;  %v2260_v45 = vld [vmem:[#allocation21 + $0x30] sm:$0xff]  }
 0x676   : > { %v1214_v51 = vpack.c.bf16 %v1213_v50, %v1213_v50 }
 0x677   : > { %2002 = vmatmul.mubr.msk.bf16.vlgmr.msra.gmra.mrb[16].mxu0 %vm804_vm2, %v1096_v47  ;;  %v1906_v47 = vld [vmem:[#allocation20] ss:$0 sm:$0xff] }
 0x678   : > { %2012 = vmatpush3.bf16.msra.mxu0 %v1221_v49  ;;  %2013 = vmatprep.mubr.msk.bf16.mxu0 %vm2818_vm1, %v2817_v8 }
 0x679   : > { %2025 = vmatprep.subr.bf16.mxu0 %v2817_v8 }
 0x67f   : > { %2014 = vmatmul.mubr.msk.bf16.vlgmr.msra.gmra.mrb[20].mxu0 %vm804_vm2, %v1214_v51 }
 0x680   : > { %2029 = vmatprep.mubr.msk.bf16.mxu0 %vm2818_vm1, %v2817_v8  ;;  %2026 = vmatpush3.bf16.msra.mxu0 %v2252_v28 }
 0x681   : > { %2027 = vmatprep.subr.bf16.mxu0 %v2817_v8 }
 0x684   : > { %2028 = vmatpush3.bf16.msra.mxu0 %v2253_v29 }
 0x715   : > { %v908_v52 = vpop.f32.mrb[8].mxu0 }
 0x716   : > { %914 = vst.msk [vmem:[#allocation2] sm:$0xff] %vm804_vm2, %v908_v52  ;;  %v1979_v53 = vpop.f32.mrb[9].mxu0 }
 0x717   : > { %v911_v54 = vpop.f32.mrb[10].mxu0 }
 0x718   : > { %v1980_v55 = vpop.f32.mrb[11].mxu0 }
 0x722   : > { %v1021_v56 = vpop.f32.mrb[12].mxu0 }
 0x723   : > { %1028 = vrot.lane.b32.xlu0 %v1021_v56, %s2830_s24  ;;  %v1991_v57 = vpop.f32.mrb[13].mxu0 }
 0x724   : > { %v1024_v58 = vpop.f32.mrb[14].mxu0 }
 0x725   : > { %v1992_v59 = vpop.f32.mrb[15].mxu0 }
 0x74a   : > { %v1139_v62 = vpop.f32.mrb[16].mxu0 }
 0x74b   : > { %1146 = vrot.lane.b32.xlu1 %v1139_v62, %s2831_s14  ;;  %v2003_v63 = vpop.f32.mrb[17].mxu0  ;;  %s1594_s14 = sshll.u32 %s678_s23, 4  ;;  %s1595_s14 = int_to_ptr.vmem [resolvable:$true] %s1594_s14 }
 0x74c   : > { %v1142_v1 = vpop.f32.mrb[18].mxu0  ;;  %s2650_s4 = scalar_lea.vmem %s1595_s14, 128 }
 0x74d   : > { %v2004_v2 = vpop.f32.mrb[19].mxu0  ;;  %p2651_p2 = scmp.ne.s32.totalorder %s1595_s14, %s2650_s4 }
 0x74f   : > { %p2652_p10 = pnand %p2651_p2, %p3632_p0 }
 0x751   : > { %p2653_p11 = pneg %p2652_p10 }
 0x752   : > { %v1257_v3 = vpop.f32.mrb[20].mxu0 }
 0x753   : > { %1264 = vrot.lane.b32.xlu0 %v1257_v3, %s2832_s26  ;;  %v2015_v4 = vpop.f32.mrb[21].mxu0  ;;  %s3463_s26 = sshll.u32 %s685_s15, 4  ;;  %s1608_s26 = int_to_ptr.vmem [resolvable:$true] %s3463_s26 }
 0x754   : > { %v1260_v5 = vpop.f32.mrb[22].mxu0 }
 0x755   : > { %v2016_v6 = vpop.f32.mrb[23].mxu0 }
 0x795   : > { %v1029_v7 = vpop.permute.xlu0 %1028 }
 0x796   : > { %1032 = vst.msk [vmem:[#allocation2] sm:$0xff] %vm1031_vm5, %v1029_v7 }
 0x7bd   : > { %v1147_v9 = vpop.permute.xlu1 %1146 }
 0x7be   : > { %1150 = vst.msk [vmem:[#allocation2] sm:$0xff] %vm1149_vm6, %v1147_v9 }
 0x7c5   : > { %v1265_v10 = vpop.permute.xlu0 %1264 }
 0x7c6   : > { %1268 = vst.msk [vmem:[#allocation2] sm:$0xff] %vm1267_vm7, %v1265_v10 }
 0x7cd   : > { %v1269_v11 = vld [vmem:[#allocation2] sm:$0xff] }
 0x7ce   : > { %v1270_v12 = vpack.c.bf16 %v1269_v11, %v1269_v11 }
 0x7d0   : > { %2022 = vmatmul.mubr.msk.bf16.vlgmr.msra.gmra.mrb[12].mxu1 %vm690_vm0, %v1270_v12 }
 0x7d1   : > { %2049 = vmatprep.mubr.msk.bf16.mxu1 %vm2818_vm1, %v2817_v8  ;;  %2034 = vmatpush3.bf16.msra.mxu1 %v2254_v30 }
 0x7d2   : > { %2035 = vmatprep.subr.bf16.mxu1 %v2817_v8 }
 0x7d5   : > { %2036 = vmatpush3.bf16.msra.mxu1 %v2255_v40 }
 0x7d6   : > { %2037 = vmatprep.subr.bf16.mxu1 %v2817_v8 }
 0x7d9   : > { %2038 = vmatpush3.bf16.msra.mxu1 %v2256_v41 }
 0x7da   : > { %2039 = vmatprep.subr.bf16.mxu1 %v2817_v8 }
 0x7dd   : > { %2040 = vmatpush3.bf16.msra.mxu1 %v2257_v42 }
 0x7de   : > { %2041 = vmatprep.subr.bf16.mxu1 %v2817_v8 }
 0x7e1   : > { %2042 = vmatpush3.bf16.msra.mxu1 %v2258_v43 }
 0x7e2   : > { %2043 = vmatprep.subr.bf16.mxu1 %v2817_v8 }
 0x7e5   : > { %2044 = vmatpush3.bf16.msra.mxu1 %v2259_v44 }
 0x7e6   : > { %2045 = vmatprep.subr.bf16.mxu1 %v2817_v8 }
 0x7e9   : > { %2046 = vmatpush3.bf16.msra.mxu1 %v2260_v45 }
 0x7ea   : > { %2047 = vmatprep.subr.bf16.mxu1 %v2817_v8 }
 0x7ed   : > { %2048 = vmatpush3.bf16.msra.mxu1 %v2261_v46 }
 0x8a3   : > { %v1331_v14 = vpop.f32.mrb[12].mxu1 }
 0x8a4   : > { %v1332_v15 = vadd.f32 %v1900_v13, %v1331_v14  ;;  %v2023_v16 = vpop.f32.mrb[13].mxu1 }
 0x8a5   : > { %v1334_v17 = vpop.f32.mrb[14].mxu1 }
 0x8a6   : > { %v3422_v18 = vadd.f32 %v1332_v15, %v3326_v0  ;;  %v2024_v19 = vpop.f32.mrb[15].mxu1 }
 0x8a8   : > { %v1340_v20 = vsel %vm690_vm0, %v3422_v18, 0.0 }
 0x8a9   : > { %1341 = vadd.xlane.f32.xlu1 %v1340_v20 }
 0x8ba   : > { %791 = vrot.lane.b32.xlu1 %v3343_v22, %s2826_s2  ;;  %s3451_s2 = sshll.u32 %s3618_s28, 7 }
 0x8bb   : > { %s3457_s24 = scalar_lea.hbm %s3631_s17, %s3451_s2 }
 0x936   : > { %v1342_v21 = vpop.xlane.xlu1 %1341 }
 0x937   : > { %v1343_v23 = vmul.f32 0.03125, %v1342_v21 }
 0x939   : > { %v1344_v24 = vsub.f32 %v3422_v18, %v1343_v23 }
 0x93a   : > { %v792_v26 = vpop.permute.xlu1 %791 }
 0x93b   : > { %794 = vst.msk [vmem:[%s685_s15] sm:$0xff] %vm690_vm0, %v792_v26  ;;  %v1345_v27 = vmul.f32 %v1344_v24, %v1344_v24 }
 0x93d   : > { %v1346_v0 = vsel %vm690_vm0, %v1345_v27, 0.0 }
 0x93e   : > { %1347 = vadd.xlane.f32.xlu0 %v1346_v0 }
 0x954   : > { %787 = vrot.lane.b32.xlu0 %v3343_v22, %s2820_s25  ;;  %s1562_s25 = sand.u32 1, %s3618_s28   ;;  %s2833_s28 = smov [#allocation25]  }
 0x955   : > { %s3465_s1 = scalar_lea.sflag [#allocation26], %s1562_s25  ;;  %s2654_s5 = sshll.u32 %s2833_s28, 4  ;;  %s2655_s5 = int_to_ptr.vmem [resolvable:$false] %s2654_s5 }
 0x956   : > { %s2656_s6 = scalar_lea.vmem %s2655_s5, 256  ;;  %p2657_p12 = scmp.lt.s32.totalorder %s1595_s14, %s2655_s5 }
 0x957   : > { %p2658_p8 = scmp.lt.s32.totalorder %s2656_s6, %s2650_s4 }
 0x959   : > { %p2659_p5 = por %p2658_p8, %p2657_p12 }
 0x95b   : > { %p2660_p7 = pnand %p2659_p5, %p2653_p11 }
 0x9cb   : > { %v1348_v31 = vpop.xlane.xlu0 %1347 }
 0x9cc   : > { %v1349_v32 = vmul.f32 0.03125, %v1348_v31 }
 0x9ce   : > { %v1350_v33 = vadd.f32 1e-05, %v1349_v32 }
 0x9cf   : > { %v788_v34 = vpop.permute.xlu0 %787 }
 0x9d0   : > { %2280 = vrsqrt.f32 %v1350_v33  ;;  %790 = vst.msk [vmem:[%s678_s23] sm:$0xff] %vm690_vm0, %v788_v34 }
 0x9da   : > { %v2281_v22 = vpop.eup %2280 }
 0x9db   : > { %v1352_v25 = vmul.f32 %v2281_v22, %v1344_v24 }
 0x9dd   : > { %v1359_v37 = vmul.f32 %v1904_v35, %v1352_v25 }
 0x9df   : > { %v1366_v38 = vadd.f32 %v1905_v36, %v1359_v37 }
 0x9e1   : > { %v1367_v39 = vpack.c.bf16 %v1366_v38, %v1366_v38 }
 0x9e3   : > { %2030 = vmatmul.mubr.msk.bf16.vlgmr.msra.gmra.mrb[24].mxu0 %vm690_vm0, %v1367_v39 }
 0xab6   : > { %v1428_v48 = vpop.f32.mrb[24].mxu0 }
 0xab7   : > { %v1429_v49 = vadd.f32 %v1906_v47, %v1428_v48  ;;  %v2031_v50 = vpop.f32.mrb[25].mxu0 }
 0xab8   : > { %v1431_v51 = vpop.f32.mrb[26].mxu0 }
 0xab9   : > { %v1435_v52 = vmul.f32 %v1429_v49, %v1429_v49  ;;  %v2032_v53 = vpop.f32.mrb[27].mxu0  ;;  %v1434_v8 = vmul.f32 0.5, %v1429_v49 }
 0xabb   : > { %v1436_v54 = vmul.f32 %v1435_v52, %v1429_v49 }
 0xabd   : > { %v1437_v55 = vmul.f32 0.044715, %v1436_v54 }
 0xabf   : > { %v1438_v56 = vadd.f32 %v1437_v55, %v1429_v49 }
 0xac1   : > { %v1439_v57 = vmul.f32 0.7978846, %v1438_v56 }
 0xac3   : > { %2282 = vtanh.f32 %v1439_v57 }
 0xacd   : > { %v2283_v58 = vpop.eup %2282 }
 0xace   : > { %v1441_v59 = vadd.f32 1.0, %v2283_v58 }
 0xad0   : > { %v1442_v60 = vmul.f32 %v1441_v59, %v1434_v8 }
 0xad2   : > { %v1443_v61 = vpack.c.bf16 %v1442_v60, %v1442_v60 }
 0xad4   : > { %2050 = vmatmul.mubr.bf16.vlgmr.msra.gmra.mrb[16].mxu1 %v1443_v61 }
 0xad5   : > { %2663 = shalt.err (!%p2660_p7)
}
 0xad6   : > { %s2664_s15 = scalar_lea.hbm %s3457_s24, 128  ;;  %s2668_s27 = scalar_lea.hbm %s3631_s17, 256 }
 0xad7   : > { %p2665_p6 = scmp.ne.s32.totalorder %s3457_s24, %s2664_s15  ;;  %p2669_p13 = scmp.lt.u32.totalorder %s3457_s24, %s3631_s17 }
 0xad8   : > { %p2670_p1 = scmp.lt.u32.totalorder %s2668_s27, %s2664_s15  ;;  %p2672_p2 = scmp.lt.u32.totalorder %s2664_s15, %s3457_s24 }
 0xad9   : > { %p2666_p9 = pnand %p2665_p6, %p3632_p0 }
 0xada   : > { %p2671_p3 = por %p2670_p1, %p2669_p13 }
 0xadb   : > { %p2667_p4 = pneg %p2666_p9 }
 0xadc   : > { %p2673_p10 = por %p2672_p2, %p2671_p3 }
 0xade   : > { %p2674_p11 = pnand %p2673_p10, %p2667_p4 }
 0xae0   : > { %2677 = shalt.err (!%p2674_p11)
}
 0xae1   : > { %2104 = dma.vmem_to_hbm [thread:$0]  (%p3632_p0), %s1595_s14, 128, %s3457_s24, %s3465_s1  }
 0xae2   : > { %s3633_s28 = sld [smem:[#allocation49_spill]]  ;;  %s2678_s25 = scalar_lea.vmem %s1608_s26, 128 }
 0xae3   : > { %p2679_p12 = scmp.ne.s32.totalorder %s1608_s26, %s2678_s25  ;;  %s2834_s15 = smov [#allocation27]  }
 0xae4   : > { %s2682_s27 = sshll.u32 %s2834_s15, 4  ;;  %s2683_s27 = int_to_ptr.vmem [resolvable:$false] %s2682_s27 }
 0xae5   : > { %p2680_p8 = pnand %p2679_p12, %p3632_p0  ;;  %s2684_s16 = scalar_lea.vmem %s2683_s27, 256 }
 0xae6   : > { %p2685_p7 = scmp.lt.s32.totalorder %s1608_s26, %s2683_s27  ;;  %p2686_p6 = scmp.lt.s32.totalorder %s2684_s16, %s2678_s25 }
 0xae7   : > { %p2681_p5 = pneg %p2680_p8 }
 0xae8   : > { %s1605_s23 = scalar_lea.hbm %s3633_s28, %s3451_s2  ;;  %p2687_p9 = por %p2686_p6, %p2685_p7 }
 0xaea   : > { %p2688_p4 = pnand %p2687_p9, %p2681_p5 }
 0xaec   : > { %2691 = shalt.err (!%p2688_p4)
}
 0xaed   : > { %s2692_s24 = scalar_lea.hbm %s1605_s23, 128  ;;  %s2696_s4 = scalar_lea.hbm %s3633_s28, 256 }
 0xaee   : > { %p2693_p13 = scmp.ne.s32.totalorder %s1605_s23, %s2692_s24  ;;  %p2697_p2 = scmp.lt.u32.totalorder %s1605_s23, %s3633_s28 }
 0xaef   : > { %p2698_p10 = scmp.lt.u32.totalorder %s2696_s4, %s2692_s24  ;;  %p2700_p12 = scmp.lt.u32.totalorder %s2692_s24, %s1605_s23 }
 0xaf0   : > { %p2694_p1 = pnand %p2693_p13, %p3632_p0 }
 0xaf1   : > { %p2699_p11 = por %p2698_p10, %p2697_p2 }
 0xaf2   : > { %p2695_p3 = pneg %p2694_p1 }
 0xaf3   : > { %p2701_p8 = por %p2700_p12, %p2699_p11 }
 0xaf5   : > { %p2702_p5 = pnand %p2701_p8, %p2695_p3 }
 0xaf7   : > { %2705 = shalt.err (!%p2702_p5)
}
 0xaf8   : > { %2105 = dma.vmem_to_hbm [thread:$0]  (%p3632_p0), %s1608_s26, 128, %s1605_s23, %s3465_s1   ;;  %v1910_v62 = vld [vmem:[#allocation23] ss:$0 sm:$0xff] }
 0xaf9   : > { %s671_s25 = scalar_lea.vmem [#allocation24], %s3294_s0  ;;  %s3634_s16 = sld [smem:[#allocation47_spill]] }
 0xafa   : > { %s1581_s15 = sshll.u32 %s671_s25, 4  ;;  %s1558_s1 = scalar_lea.sflag [#allocation5], %s3291_s29  ;;  %s3511_s15 = int_to_ptr.vmem [resolvable:$true] %s1581_s15 }
 0xafb   : > { %s2706_s0 = scalar_lea.vmem %s3511_s15, 128  ;;  %s2835_s26 = smov [#allocation24]  }
 0xafc   : > { %p2707_p7 = scmp.ne.s32.totalorder %s3511_s15, %s2706_s0  ;;  %s2710_s23 = sshll.u32 %s2835_s26, 4  ;;  %s2711_s23 = int_to_ptr.vmem [resolvable:$false] %s2710_s23 }
 0xafd   : > { %s2712_s14 = scalar_lea.vmem %s2711_s23, 256  ;;  %p2713_p4 = scmp.lt.s32.totalorder %s3511_s15, %s2711_s23 }
 0xafe   : > { %p2708_p6 = pnand %p2707_p7, %p3632_p0  ;;  %p2714_p13 = scmp.lt.s32.totalorder %s2712_s14, %s2706_s0 }
 0xaff   : > { %s3509_s24 = scalar_lea.hbm %s3634_s16, %s3451_s2 }
 0xb00   : > { %p2709_p9 = pneg %p2708_p6  ;;  %p2715_p1 = por %p2714_p13, %p2713_p4 }
 0xb02   : > { %p2716_p3 = pnand %p2715_p1, %p2709_p9 }
 0xba7   : > { %v1549_v63 = vpop.f32.mrb[16].mxu1 }
 0xba8   : > { %v1550_v1 = vadd.f32 %v1910_v62, %v1549_v63  ;;  %v2051_v2 = vpop.f32.mrb[17].mxu1 }
 0xba9   : > { %v1552_v3 = vpop.f32.mrb[18].mxu1 }
 0xbaa   : > { %v1555_v4 = vadd.f32 %v1550_v1, %v3422_v18  ;;  %v2052_v5 = vpop.f32.mrb[19].mxu1 }
 0xbac   : > { %1556 = vst.msk [vmem:[%s671_s25] sm:$0xff] %vm690_vm0, %v1555_v4 }
 0xbad   : > { %2719 = shalt.err (!%p2716_p3)
}
 0xbae   : > { %s2720_s29 = scalar_lea.hbm %s3509_s24, 128  ;;  %s2724_s4 = scalar_lea.hbm %s3634_s16, 256 }
 0xbaf   : > { %p2721_p2 = scmp.ne.s32.totalorder %s3509_s24, %s2720_s29  ;;  %p2725_p12 = scmp.lt.u32.totalorder %s3509_s24, %s3634_s16 }
 0xbb0   : > { %p2726_p8 = scmp.lt.u32.totalorder %s2724_s4, %s2720_s29  ;;  %p2728_p7 = scmp.lt.u32.totalorder %s2720_s29, %s3509_s24 }
 0xbb1   : > { %p2722_p10 = pnand %p2721_p2, %p3632_p0 }
 0xbb2   : > { %p2727_p5 = por %p2726_p8, %p2725_p12 }
 0xbb3   : > { %p2723_p11 = pneg %p2722_p10 }
 0xbb4   : > { %p2729_p6 = por %p2728_p7, %p2727_p5 }
 0xbb6   : > { %p2730_p9 = pnand %p2729_p6, %p2723_p11 }
 0xbb8   : > { %2733 = shalt.err (!%p2730_p9)
}
 0xbb9   : > { %2103 = dma.vmem_to_hbm [thread:$0]  (%p3632_p0), %s3511_s15, 128, %s3509_s24, %s1558_s1  }
 0xbba PF: > { %s1619_s7 = sand.u32 1, %s2788_s18   ;;  %p3635_p4 = scmp.ne.s32.totalorder %s3613_s13, 0 }
 0xbbb   : > { %p3636_p13 = scmp.ge.s32.totalorder %s2800_s21, 2  ;;  %s1620_s27 = scalar_lea.sflag [#allocation5], %s1619_s7 }
 0xbbd   : > { %p2151_p1 = pnand %p3636_p13, %p3635_p4 }
 0xbbf   : > { %2779 = dma.done.wait (!%p2151_p1), %s1620_s27, 128  }
 0xbc0   : > { %2781 = vsyncadd (!%p2151_p1), %s1620_s27, 4294967168  ;;  %s3637_s0 = sadd.s32 4294967294, %s2800_s21  }
 0xbc1   : > { %s1628_s26 = sand.u32 1, %s3637_s0  }
 0xbc2   : > { %s1629_s23 = scalar_lea.sflag [#allocation26], %s1628_s26 }
 0xbc3   : > { %2783 = dma.done.wait (!%p2151_p1), %s1629_s23, 256  }
 0xbc4   : > { %2785 = vsyncadd (!%p2151_p1), %s1629_s23, 4294967040  ;;  %p38_p0 = scmp.ge.s32.totalorder %s3213_s30, 4   ;;  %s3638_s18 = smov %s2792_s19 }
 0xbc5   : > { %s3639_s19 = smov %s2796_s20  ;;  %s3640_s20 = smov %s3224_s22 }
 0xbc6   : > { %s3641_s21 = smov %s3213_s30  ;;  %40 = sbr.rel (!%p38_p0) target bundleno = 25 (0x19), region = 197 }
 0xbcd   :  { %1643 = vsyncpa [#allocation4], 1 }
 0xbce   :  { %1645 = vsyncpa [#allocation4 + $0x1], 1 }
 0xbcf   :  { %1646 = vsyncpa [#allocation7], 1 }
 0xbd0   :  { %1647 = vsyncpa [#allocation10], 1 }
 0xbd1   :  { %1648 = vsyncpa [#allocation13], 1 }
 0xbd2   :  { %1649 = vsyncpa [#allocation16], 1 }
 0xbd3   :  { %1650 = vsyncpa [#allocation19], 1 }
 0xbd4   :  { %1651 = vsyncpa [#allocation22], 1 }
 0xbd5   :  { %1652 = vsyncpa [#allocation5], 1 }
 0xbd6   :  { %1654 = vsyncpa [#allocation5 + $0x1], 1 }
 0xbd7   :  { %1655 = vsyncpa [#allocation26], 1 }
 0xbd8   :  { %1657 = vsyncpa [#allocation26 + $0x1], 1 }

</bundles_post_ra>
